<compile_context>
chip_gen: v7x
topology: tpu7x:2x2x1
jax: 0.10.0
libtpu: 0.0.40
codegen_flags: <defaults>
</compile_context>

<pallas_src>
import functools

import jax
import jax.numpy as jnp
from jax.experimental import pallas as pl
from jax.experimental.pallas import tpu as pltpu


def _tca_kernel(xf_ref, xs_ref, wqkv_ref, bqkv_ref, wout_ref, bout_ref,
                y_ref, ctxf_ref, ctxs_ref, *, num_heads):
    """One grid step = `batch_block` batch elements, fully resident in VMEM."""
    BB, T, D = xf_ref.shape
    hd = D // num_heads
    scale = 1.0 / (hd ** 0.5)          # matches torch: / head_dim ** 0.5

    xf = xf_ref[...].reshape(BB * T, D)
    xs = xs_ref[...].reshape(BB * T, D)

    # Fused QKV projections: one [BB*T, D] x [D, 3D] matmul per modality.
    qkv_f = (jnp.dot(xf, wqkv_ref[0], preferred_element_type=jnp.float32)
             + bqkv_ref[0])
    qkv_s = (jnp.dot(xs, wqkv_ref[1], preferred_element_type=jnp.float32)
             + bqkv_ref[1])

    # Per-head cross attention.  q/k/v for head h are conceptually
    # torch.cat([face, skeleton], dim=-1); instead of materializing the concat
    # every contraction is split into a face dot + a skeleton dot (MXU only,
    # no XLU relayout traffic).
    for h in range(num_heads):
        lo = h * hd
        qf = qkv_f[:, lo:lo + hd].reshape(BB, T, hd)
        kf = qkv_f[:, D + lo:D + lo + hd].reshape(BB, T, hd)
        vf = qkv_f[:, 2 * D + lo:2 * D + lo + hd].reshape(BB, T, hd)
        qs = qkv_s[:, lo:lo + hd].reshape(BB, T, hd)
        ks = qkv_s[:, D + lo:D + lo + hd].reshape(BB, T, hd)
        vs = qkv_s[:, 2 * D + lo:2 * D + lo + hd].reshape(BB, T, hd)

        s = (jnp.einsum('bid,bjd->bij', qf, kf,
                        preferred_element_type=jnp.float32)
             + jnp.einsum('bid,bjd->bij', qs, ks,
                          preferred_element_type=jnp.float32)) * scale
        s = s - jnp.max(s, axis=-1, keepdims=True)
        e = jnp.exp(s)
        p = e * pl.reciprocal(jnp.sum(e, axis=-1, keepdims=True), approx=True)
        # TODO(synk): attention dropout omitted (eval-mode identity).

        cf = jnp.einsum('bij,bjd->bid', p, vf,
                        preferred_element_type=jnp.float32)
        cs = jnp.einsum('bij,bjd->bid', p, vs,
                        preferred_element_type=jnp.float32)
        ctxf_ref[:, lo:lo + hd] = cf.reshape(BB * T, hd)
        ctxs_ref[:, lo:lo + hd] = cs.reshape(BB * T, hd)

    # Fused output projection: out_proj / out_proj_2 were repacked in the
    # wrapper into block-diagonal [D, 2D] weights so that
    # y[..., :D] == out_proj(x1) and y[..., D:] == out_proj_2(x2).
    y = (jnp.dot(ctxf_ref[...], wout_ref[0], preferred_element_type=jnp.float32)
         + jnp.dot(ctxs_ref[...], wout_ref[1], preferred_element_type=jnp.float32)
         + bout_ref[...])
    y_ref[...] = y.reshape(BB, T, 2 * D).astype(y_ref.dtype)


def _pack_params(params, d_model, num_heads):
    """One-time wrapper-side fusion of the 16 Linear params into 4 operands."""
    D, H = d_model, num_heads
    hd = D // H

    w_qkv = jnp.stack([
        jnp.concatenate([params['wq'], params['wk'], params['wv']], axis=1),
        jnp.concatenate([params['wq2'], params['wk2'], params['wv2']], axis=1),
    ])                                                          # [2, D, 3D]
    b_qkv = jnp.stack([
        jnp.concatenate([params['bq'], params['bk'], params['bv']], axis=1),
        jnp.concatenate([params['bq2'], params['bk2'], params['bv2']], axis=1),
    ])                                                          # [2, 1, 3D]

    # Kernel-side context layout: ctx_f[:, h*hd:(h+1)*hd] = face context of
    # head h (ctx_s the skeleton part).  The torch layout after
    # rearrange + chunk is:
    #   x1 = heads 0..H/2-1, each head = [face(hd) | skel(hd)]  -> out_proj
    #   x2 = heads H/2..H-1, same per-head layout               -> out_proj_2
    # Re-index wo/wo2 rows so y = ctx_f @ W_face + ctx_s @ W_skel + b gives
    # y[:, :D] = out_proj(x1) and y[:, D:] = out_proj_2(x2).
    wo_r = params['wo'].reshape(H // 2, 2, hd, D)    # (head, face/skel, hd, D)
    wo2_r = params['wo2'].reshape(H // 2, 2, hd, D)
    z = jnp.zeros((D // 2, D), params['wo'].dtype)

    def half(m):  # m = 0 (face rows) or 1 (skeleton rows)
        top = jnp.concatenate([wo_r[:, m].reshape(D // 2, D), z], axis=1)
        bot = jnp.concatenate([z, wo2_r[:, m].reshape(D // 2, D)], axis=1)
        return jnp.concatenate([top, bot], axis=0)              # [D, 2D]

    w_out = jnp.stack([half(0), half(1)])                       # [2, D, 2D]
    b_out = jnp.concatenate([params['bo'], params['bo2']], axis=1)  # [1, 2D]
    return w_qkv, b_qkv, w_out, b_out


def temporal_cross_attention(x_face, x_skeleton, params, num_heads,
                             batch_block=None):
    B, T, D = x_face.shape
    assert x_skeleton.shape == (B, T, D)
    assert D % num_heads == 0 and num_heads % 2 == 0

    if batch_block is None:
        # Whole-batch blocks, but keep >= 2 grid steps when possible so v7x's
        # two TensorCores both get work (v5e/v6e have a single TC).
        batch_block = 1 if B < 2 else max(
            d for d in range(1, B // 2 + 1) if B % d == 0)
    assert B % batch_block == 0
    grid = (B // batch_block,)

    w_qkv, b_qkv, w_out, b_out = _pack_params(params, D, num_heads)

    x_spec = pl.BlockSpec((batch_block, T, D), lambda b: (b, 0, 0))
    y_spec = pl.BlockSpec((batch_block, T, 2 * D), lambda b: (b, 0, 0))
    in_specs = [
        x_spec, x_spec,
        pl.BlockSpec((2, D, 3 * D), lambda b: (0, 0, 0)),
        pl.BlockSpec((2, 1, 3 * D), lambda b: (0, 0, 0)),
        pl.BlockSpec((2, D, 2 * D), lambda b: (0, 0, 0)),
        pl.BlockSpec((1, 2 * D), lambda b: (0, 0)),
    ]

    y = pl.pallas_call(
        functools.partial(_tca_kernel, num_heads=num_heads),
        out_shape=jax.ShapeDtypeStruct((B, T, 2 * D), x_face.dtype),
        grid=grid,
        in_specs=in_specs,
        out_specs=y_spec,
        scratch_shapes=[pltpu.VMEM((batch_block * T, D), jnp.float32),
                        pltpu.VMEM((batch_block * T, D), jnp.float32)],
        compiler_params=pltpu.CompilerParams(
            dimension_semantics=("parallel",)),
    )(x_face, x_skeleton, w_qkv, b_qkv, w_out, b_out)

    # Split the lane-dense fused output back into (out_proj(x1), out_proj_2(x2)).
    return y[..., :D], y[..., D:]


def init_params(key, d_model):
    """Deterministic synthetic parameters (shapes from the module's __init__)."""
    w_names = ['wq', 'wk', 'wv', 'wq2', 'wk2', 'wv2', 'wo', 'wo2']
    keys = jax.random.split(key, 2 * len(w_names))
    params = {}
    scale = 1.0 / (d_model ** 0.5)
    for i, n in enumerate(w_names):
        params[n] = (jax.random.normal(keys[2 * i], (d_model, d_model),
                                       jnp.float32) * scale)
        params['b' + n[1:]] = (jax.random.normal(keys[2 * i + 1], (1, d_model),
                                                 jnp.float32) * 0.01)
    # note: rel_pos_bias exists in the torch module but is unused in forward().
    return params


def reference(x_face, x_skeleton, params, num_heads):
    """Pure-JAX reference mirroring the PyTorch forward (eval mode)."""
    B, T, D = x_face.shape
    hd = D // num_heads

    def proj(x, w, b):
        return x @ w + b

    def split_heads(a):  # [B,T,D] -> [B,H,T,hd]
        return a.reshape(B, T, num_heads, hd).transpose(0, 2, 1, 3)

    qf = split_heads(proj(x_face, params['wq'], params['bq']))
    kf = split_heads(proj(x_face, params['wk'], params['bk']))
    vf = split_heads(proj(x_face, params['wv'], params['bv']))
    qs = split_heads(proj(x_skeleton, params['wq2'], params['bq2']))
    ks = split_heads(proj(x_skeleton, params['wk2'], params['bk2']))
    vs = split_heads(proj(x_skeleton, params['wv2'], params['bv2']))

    q = jnp.concatenate([qf, qs], axis=-1)
    k = jnp.concatenate([kf, ks], axis=-1)
    v = jnp.concatenate([vf, vs], axis=-1)

    scores = jnp.einsum('bhid,bhjd->bhij', q, k) / (hd ** 0.5)
    attn = jax.nn.softmax(scores, axis=-1)
    out = jnp.einsum('bhij,bhjd->bhid', attn, v)          # [B,H,T,2hd]
    out = out.transpose(0, 2, 1, 3).reshape(B, T, 2 * D)  # 'b h t d -> b t (h d)'
    x1, x2 = out[..., :D], out[..., D:]
    return x1 @ params['wo'] + params['bo'], x2 @ params['wo2'] + params['bo2']


if __name__ == "__main__":
    B, T, D, H = 2, 8, 32, 8   # batch*group, time, d_model, num_heads (head_dim=4)
    key = jax.random.PRNGKey(0)
    k_face, k_skel, k_params = jax.random.split(key, 3)
    x_face = jax.random.normal(k_face, (B, T, D), jnp.float32)
    x_skeleton = jax.random.normal(k_skel, (B, T, D), jnp.float32)
    params = init_params(k_params, D)

    y1, y2 = temporal_cross_attention(x_face, x_skeleton, params, H)
    jax.block_until_ready((y1, y2))

    r1, r2 = reference(x_face, x_skeleton, params, H)
    assert y1.shape == (B, T, D) and y2.shape == (B, T, D)
    # Slightly looser tolerance than a bit-exact softmax: the kernel uses the
    # EUP approximate reciprocal for the softmax denominator.
    assert jnp.allclose(y1, r1, atol=5e-3, rtol=5e-3), "out_proj mismatch"
    assert jnp.allclose(y2, r2, atol=5e-3, rtol=5e-3), "out_proj_2 mismatch"
    print("KERNEL_OK")
</pallas_src>

<mosaic_0001>
module attributes {stable_mosaic.version = 11 : i64} {
  func.func @_tca_kernel(%arg0: i32, %arg1: memref<1x8x32xf32, #tpu.memory_space<vmem>>, %arg2: memref<1x8x32xf32, #tpu.memory_space<vmem>>, %arg3: memref<2x32x96xf32, #tpu.memory_space<vmem>>, %arg4: memref<2x1x96xf32, #tpu.memory_space<vmem>>, %arg5: memref<2x32x64xf32, #tpu.memory_space<vmem>>, %arg6: memref<1x64xf32, #tpu.memory_space<vmem>>, %arg7: memref<1x8x64xf32, #tpu.memory_space<vmem>>, %arg8: memref<8x32xf32, #tpu.memory_space<vmem>>, %arg9: memref<8x32xf32, #tpu.memory_space<vmem>>) attributes {dimension_semantics = [#tpu.dimension_semantics<parallel>], iteration_bounds = array<i64: 2>, scalar_prefetch = 0 : i64, scratch_operands = 2 : i64, tpu.core_type = #tpu.core_type<tc>, window_params = [{transform_indices = @transform_0, window_bounds = array<i64: 1, 8, 32>}, {transform_indices = @transform_1, window_bounds = array<i64: 1, 8, 32>}, {pipeline_mode = #tpu.pipeline_mode<synchronous>, transform_indices = @transform_2, window_bounds = array<i64: 2, 32, 96>}, {pipeline_mode = #tpu.pipeline_mode<synchronous>, transform_indices = @transform_3, window_bounds = array<i64: 2, 1, 96>}, {pipeline_mode = #tpu.pipeline_mode<synchronous>, transform_indices = @transform_4, window_bounds = array<i64: 2, 32, 64>}, {pipeline_mode = #tpu.pipeline_mode<synchronous>, transform_indices = @transform_5, window_bounds = array<i64: 1, 64>}, {transform_indices = @transform_6, window_bounds = array<i64: 1, 8, 64>}]} {
    %c0 = arith.constant 0 : index
    %c0_0 = arith.constant 0 : index
    %c0_1 = arith.constant 0 : index
    %0 = vector.load %arg1[%c0, %c0_0, %c0_1] : memref<1x8x32xf32, #tpu.memory_space<vmem>>, vector<1x8x32xf32>
    %1 = vector.shape_cast %0 : vector<1x8x32xf32> to vector<8x32xf32>
    %c0_2 = arith.constant 0 : index
    %c0_3 = arith.constant 0 : index
    %c0_4 = arith.constant 0 : index
    %2 = vector.load %arg2[%c0_2, %c0_3, %c0_4] : memref<1x8x32xf32, #tpu.memory_space<vmem>>, vector<1x8x32xf32>
    %3 = vector.shape_cast %2 : vector<1x8x32xf32> to vector<8x32xf32>
    %c0_5 = arith.constant 0 : index
    %c0_6 = arith.constant 0 : index
    %c0_7 = arith.constant 0 : index
    %4 = vector.load %arg3[%c0_5, %c0_6, %c0_7] : memref<2x32x96xf32, #tpu.memory_space<vmem>>, vector<1x32x96xf32>
    %5 = vector.shape_cast %4 : vector<1x32x96xf32> to vector<32x96xf32>
    %cst = arith.constant dense<0.000000e+00> : vector<8x96xf32>
    %6 = tpu.matmul %1, %5, %cst {dimension_numbers = #tpu.dot_dimension_numbers<[1], [0], [0], [1], [0, 0, 1, 1], [], []>} : vector<8x32xf32>, vector<32x96xf32>, vector<8x96xf32> -> vector<8x96xf32>
    %c0_8 = arith.constant 0 : index
    %c0_9 = arith.constant 0 : index
    %c0_10 = arith.constant 0 : index
    %7 = vector.load %arg4[%c0_8, %c0_9, %c0_10] : memref<2x1x96xf32, #tpu.memory_space<vmem>>, vector<1x1x96xf32>
    %8 = vector.shape_cast %7 : vector<1x1x96xf32> to vector<1x96xf32>
    %9 = vector.broadcast %8 : vector<1x96xf32> to vector<8x96xf32>
    %10 = arith.addf %6, %9 : vector<8x96xf32>
    %c1 = arith.constant 1 : index
    %c0_11 = arith.constant 0 : index
    %c0_12 = arith.constant 0 : index
    %11 = vector.load %arg3[%c1, %c0_11, %c0_12] : memref<2x32x96xf32, #tpu.memory_space<vmem>>, vector<1x32x96xf32>
    %12 = vector.shape_cast %11 : vector<1x32x96xf32> to vector<32x96xf32>
    %cst_13 = arith.constant dense<0.000000e+00> : vector<8x96xf32>
    %13 = tpu.matmul %3, %12, %cst_13 {dimension_numbers = #tpu.dot_dimension_numbers<[1], [0], [0], [1], [0, 0, 1, 1], [], []>} : vector<8x32xf32>, vector<32x96xf32>, vector<8x96xf32> -> vector<8x96xf32>
    %c1_14 = arith.constant 1 : index
    %c0_15 = arith.constant 0 : index
    %c0_16 = arith.constant 0 : index
    %14 = vector.load %arg4[%c1_14, %c0_15, %c0_16] : memref<2x1x96xf32, #tpu.memory_space<vmem>>, vector<1x1x96xf32>
    %15 = vector.shape_cast %14 : vector<1x1x96xf32> to vector<1x96xf32>
    %16 = vector.broadcast %15 : vector<1x96xf32> to vector<8x96xf32>
    %17 = arith.addf %13, %16 : vector<8x96xf32>
    %18 = vector.extract_strided_slice %10 {offsets = [0, 0], sizes = [8, 4], strides = [1, 1]} : vector<8x96xf32> to vector<8x4xf32>
    %19 = vector.shape_cast %18 : vector<8x4xf32> to vector<1x8x4xf32>
    %20 = vector.extract_strided_slice %10 {offsets = [0, 32], sizes = [8, 4], strides = [1, 1]} : vector<8x96xf32> to vector<8x4xf32>
    %21 = vector.shape_cast %20 : vector<8x4xf32> to vector<1x8x4xf32>
    %22 = vector.extract_strided_slice %10 {offsets = [0, 64], sizes = [8, 4], strides = [1, 1]} : vector<8x96xf32> to vector<8x4xf32>
    %23 = vector.shape_cast %22 : vector<8x4xf32> to vector<1x8x4xf32>
    %24 = vector.extract_strided_slice %17 {offsets = [0, 0], sizes = [8, 4], strides = [1, 1]} : vector<8x96xf32> to vector<8x4xf32>
    %25 = vector.shape_cast %24 : vector<8x4xf32> to vector<1x8x4xf32>
    %26 = vector.extract_strided_slice %17 {offsets = [0, 32], sizes = [8, 4], strides = [1, 1]} : vector<8x96xf32> to vector<8x4xf32>
    %27 = vector.shape_cast %26 : vector<8x4xf32> to vector<1x8x4xf32>
    %28 = vector.extract_strided_slice %17 {offsets = [0, 64], sizes = [8, 4], strides = [1, 1]} : vector<8x96xf32> to vector<8x4xf32>
    %29 = vector.shape_cast %28 : vector<8x4xf32> to vector<1x8x4xf32>
    "tpu.trace_start"() <{level = 10 : i32, message = "bid,bjd->bij"}> : () -> ()
    %cst_17 = arith.constant dense<0.000000e+00> : vector<1x8x8xf32>
    %30 = tpu.matmul %19, %21, %cst_17 {dimension_numbers = #tpu.dot_dimension_numbers<[2], [2], [1], [1], [0, 0, 0, 1, 1, 1], [0], [0]>} : vector<1x8x4xf32>, vector<1x8x4xf32>, vector<1x8x8xf32> -> vector<1x8x8xf32>
    %cst_18 = arith.constant dense<0.000000e+00> : vector<1x8x8xf32>
    %31 = tpu.matmul %25, %27, %cst_18 {dimension_numbers = #tpu.dot_dimension_numbers<[2], [2], [1], [1], [0, 0, 0, 1, 1, 1], [0], [0]>} : vector<1x8x4xf32>, vector<1x8x4xf32>, vector<1x8x8xf32> -> vector<1x8x8xf32>
    "tpu.trace_stop"() : () -> ()
    %32 = arith.addf %30, %31 : vector<1x8x8xf32>
    %cst_19 = arith.constant 5.000000e-01 : f32
    %33 = vector.broadcast %cst_19 : f32 to vector<1x8x8xf32>
    %34 = arith.mulf %32, %33 : vector<1x8x8xf32>
    %cst_20 = arith.constant dense<0xFF800000> : vector<1x8xf32>
    %35 = vector.multi_reduction <maximumf>, %34, %cst_20 [2] : vector<1x8x8xf32> to vector<1x8xf32>
    %36 = vector.shape_cast %35 : vector<1x8xf32> to vector<1x8x1xf32>
    %37 = vector.broadcast %36 : vector<1x8x1xf32> to vector<1x8x8xf32>
    %38 = arith.subf %34, %37 : vector<1x8x8xf32>
    %39 = math.exp %38 : vector<1x8x8xf32>
    %cst_21 = arith.constant dense<0.000000e+00> : vector<1x8xf32>
    %40 = vector.multi_reduction <add>, %39, %cst_21 [2] : vector<1x8x8xf32> to vector<1x8xf32>
    %41 = vector.shape_cast %40 : vector<1x8xf32> to vector<1x8x1xf32>
    %42 = tpu.reciprocal %41 {approx = true} : vector<1x8x1xf32> -> vector<1x8x1xf32>
    %43 = vector.broadcast %42 : vector<1x8x1xf32> to vector<1x8x8xf32>
    %44 = arith.mulf %39, %43 : vector<1x8x8xf32>
    "tpu.trace_start"() <{level = 10 : i32, message = "bij,bjd->bid"}> : () -> ()
    %cst_22 = arith.constant dense<0.000000e+00> : vector<1x8x4xf32>
    %45 = tpu.matmul %44, %23, %cst_22 {dimension_numbers = #tpu.dot_dimension_numbers<[2], [1], [1], [2], [0, 0, 0, 1, 1, 2], [0], [0]>} : vector<1x8x8xf32>, vector<1x8x4xf32>, vector<1x8x4xf32> -> vector<1x8x4xf32>
    %cst_23 = arith.constant dense<0.000000e+00> : vector<1x8x4xf32>
    %46 = tpu.matmul %44, %29, %cst_23 {dimension_numbers = #tpu.dot_dimension_numbers<[2], [1], [1], [2], [0, 0, 0, 1, 1, 2], [0], [0]>} : vector<1x8x8xf32>, vector<1x8x4xf32>, vector<1x8x4xf32> -> vector<1x8x4xf32>
    "tpu.trace_stop"() : () -> ()
    %47 = vector.shape_cast %45 : vector<1x8x4xf32> to vector<8x4xf32>
    %c0_24 = arith.constant 0 : index
    %c0_25 = arith.constant 0 : index
    %48 = vector.load %arg8[%c0_24, %c0_25] : memref<8x32xf32, #tpu.memory_space<vmem>>, vector<8x4xf32>
    tpu.vector_store %arg8[%c0_24, %c0_25], %47 {strides = array<i32>} : memref<8x32xf32, #tpu.memory_space<vmem>>, vector<8x4xf32>,
    %49 = vector.shape_cast %46 : vector<1x8x4xf32> to vector<8x4xf32>
    %c0_26 = arith.constant 0 : index
    %c0_27 = arith.constant 0 : index
    %50 = vector.load %arg9[%c0_26, %c0_27] : memref<8x32xf32, #tpu.memory_space<vmem>>, vector<8x4xf32>
    tpu.vector_store %arg9[%c0_26, %c0_27], %49 {strides = array<i32>} : memref<8x32xf32, #tpu.memory_space<vmem>>, vector<8x4xf32>,
    %51 = vector.extract_strided_slice %10 {offsets = [0, 4], sizes = [8, 4], strides = [1, 1]} : vector<8x96xf32> to vector<8x4xf32>
    %52 = vector.shape_cast %51 : vector<8x4xf32> to vector<1x8x4xf32>
    %53 = vector.extract_strided_slice %10 {offsets = [0, 36], sizes = [8, 4], strides = [1, 1]} : vector<8x96xf32> to vector<8x4xf32>
    %54 = vector.shape_cast %53 : vector<8x4xf32> to vector<1x8x4xf32>
    %55 = vector.extract_strided_slice %10 {offsets = [0, 68], sizes = [8, 4], strides = [1, 1]} : vector<8x96xf32> to vector<8x4xf32>
    %56 = vector.shape_cast %55 : vector<8x4xf32> to vector<1x8x4xf32>
    %57 = vector.extract_strided_slice %17 {offsets = [0, 4], sizes = [8, 4], strides = [1, 1]} : vector<8x96xf32> to vector<8x4xf32>
    %58 = vector.shape_cast %57 : vector<8x4xf32> to vector<1x8x4xf32>
    %59 = vector.extract_strided_slice %17 {offsets = [0, 36], sizes = [8, 4], strides = [1, 1]} : vector<8x96xf32> to vector<8x4xf32>
    %60 = vector.shape_cast %59 : vector<8x4xf32> to vector<1x8x4xf32>
    %61 = vector.extract_strided_slice %17 {offsets = [0, 68], sizes = [8, 4], strides = [1, 1]} : vector<8x96xf32> to vector<8x4xf32>
    %62 = vector.shape_cast %61 : vector<8x4xf32> to vector<1x8x4xf32>
    "tpu.trace_start"() <{level = 10 : i32, message = "bid,bjd->bij"}> : () -> ()
    %cst_28 = arith.constant dense<0.000000e+00> : vector<1x8x8xf32>
    %63 = tpu.matmul %52, %54, %cst_28 {dimension_numbers = #tpu.dot_dimension_numbers<[2], [2], [1], [1], [0, 0, 0, 1, 1, 1], [0], [0]>} : vector<1x8x4xf32>, vector<1x8x4xf32>, vector<1x8x8xf32> -> vector<1x8x8xf32>
    %cst_29 = arith.constant dense<0.000000e+00> : vector<1x8x8xf32>
    %64 = tpu.matmul %58, %60, %cst_29 {dimension_numbers = #tpu.dot_dimension_numbers<[2], [2], [1], [1], [0, 0, 0, 1, 1, 1], [0], [0]>} : vector<1x8x4xf32>, vector<1x8x4xf32>, vector<1x8x8xf32> -> vector<1x8x8xf32>
    "tpu.trace_stop"() : () -> ()
    %65 = arith.addf %63, %64 : vector<1x8x8xf32>
    %cst_30 = arith.constant 5.000000e-01 : f32
    %66 = vector.broadcast %cst_30 : f32 to vector<1x8x8xf32>
    %67 = arith.mulf %65, %66 : vector<1x8x8xf32>
    %cst_31 = arith.constant dense<0xFF800000> : vector<1x8xf32>
    %68 = vector.multi_reduction <maximumf>, %67, %cst_31 [2] : vector<1x8x8xf32> to vector<1x8xf32>
    %69 = vector.shape_cast %68 : vector<1x8xf32> to vector<1x8x1xf32>
    %70 = vector.broadcast %69 : vector<1x8x1xf32> to vector<1x8x8xf32>
    %71 = arith.subf %67, %70 : vector<1x8x8xf32>
    %72 = math.exp %71 : vector<1x8x8xf32>
    %cst_32 = arith.constant dense<0.000000e+00> : vector<1x8xf32>
    %73 = vector.multi_reduction <add>, %72, %cst_32 [2] : vector<1x8x8xf32> to vector<1x8xf32>
    %74 = vector.shape_cast %73 : vector<1x8xf32> to vector<1x8x1xf32>
    %75 = tpu.reciprocal %74 {approx = true} : vector<1x8x1xf32> -> vector<1x8x1xf32>
    %76 = vector.broadcast %75 : vector<1x8x1xf32> to vector<1x8x8xf32>
    %77 = arith.mulf %72, %76 : vector<1x8x8xf32>
    "tpu.trace_start"() <{level = 10 : i32, message = "bij,bjd->bid"}> : () -> ()
    %cst_33 = arith.constant dense<0.000000e+00> : vector<1x8x4xf32>
    %78 = tpu.matmul %77, %56, %cst_33 {dimension_numbers = #tpu.dot_dimension_numbers<[2], [1], [1], [2], [0, 0, 0, 1, 1, 2], [0], [0]>} : vector<1x8x8xf32>, vector<1x8x4xf32>, vector<1x8x4xf32> -> vector<1x8x4xf32>
    %cst_34 = arith.constant dense<0.000000e+00> : vector<1x8x4xf32>
    %79 = tpu.matmul %77, %62, %cst_34 {dimension_numbers = #tpu.dot_dimension_numbers<[2], [1], [1], [2], [0, 0, 0, 1, 1, 2], [0], [0]>} : vector<1x8x8xf32>, vector<1x8x4xf32>, vector<1x8x4xf32> -> vector<1x8x4xf32>
    "tpu.trace_stop"() : () -> ()
    %80 = vector.shape_cast %78 : vector<1x8x4xf32> to vector<8x4xf32>
    %c0_35 = arith.constant 0 : index
    %c4 = arith.constant 4 : index
    %81 = vector.load %arg8[%c0_35, %c4] : memref<8x32xf32, #tpu.memory_space<vmem>>, vector<8x4xf32>
    tpu.vector_store %arg8[%c0_35, %c4], %80 {strides = array<i32>} : memref<8x32xf32, #tpu.memory_space<vmem>>, vector<8x4xf32>,
    %82 = vector.shape_cast %79 : vector<1x8x4xf32> to vector<8x4xf32>
    %c0_36 = arith.constant 0 : index
    %c4_37 = arith.constant 4 : index
    %83 = vector.load %arg9[%c0_36, %c4_37] : memref<8x32xf32, #tpu.memory_space<vmem>>, vector<8x4xf32>
    tpu.vector_store %arg9[%c0_36, %c4_37], %82 {strides = array<i32>} : memref<8x32xf32, #tpu.memory_space<vmem>>, vector<8x4xf32>,
    %84 = vector.extract_strided_slice %10 {offsets = [0, 8], sizes = [8, 4], strides = [1, 1]} : vector<8x96xf32> to vector<8x4xf32>
    %85 = vector.shape_cast %84 : vector<8x4xf32> to vector<1x8x4xf32>
    %86 = vector.extract_strided_slice %10 {offsets = [0, 40], sizes = [8, 4], strides = [1, 1]} : vector<8x96xf32> to vector<8x4xf32>
    %87 = vector.shape_cast %86 : vector<8x4xf32> to vector<1x8x4xf32>
    %88 = vector.extract_strided_slice %10 {offsets = [0, 72], sizes = [8, 4], strides = [1, 1]} : vector<8x96xf32> to vector<8x4xf32>
    %89 = vector.shape_cast %88 : vector<8x4xf32> to vector<1x8x4xf32>
    %90 = vector.extract_strided_slice %17 {offsets = [0, 8], sizes = [8, 4], strides = [1, 1]} : vector<8x96xf32> to vector<8x4xf32>
    %91 = vector.shape_cast %90 : vector<8x4xf32> to vector<1x8x4xf32>
    %92 = vector.extract_strided_slice %17 {offsets = [0, 40], sizes = [8, 4], strides = [1, 1]} : vector<8x96xf32> to vector<8x4xf32>
    %93 = vector.shape_cast %92 : vector<8x4xf32> to vector<1x8x4xf32>
    %94 = vector.extract_strided_slice %17 {offsets = [0, 72], sizes = [8, 4], strides = [1, 1]} : vector<8x96xf32> to vector<8x4xf32>
    %95 = vector.shape_cast %94 : vector<8x4xf32> to vector<1x8x4xf32>
    "tpu.trace_start"() <{level = 10 : i32, message = "bid,bjd->bij"}> : () -> ()
    %cst_38 = arith.constant dense<0.000000e+00> : vector<1x8x8xf32>
    %96 = tpu.matmul %85, %87, %cst_38 {dimension_numbers = #tpu.dot_dimension_numbers<[2], [2], [1], [1], [0, 0, 0, 1, 1, 1], [0], [0]>} : vector<1x8x4xf32>, vector<1x8x4xf32>, vector<1x8x8xf32> -> vector<1x8x8xf32>
    %cst_39 = arith.constant dense<0.000000e+00> : vector<1x8x8xf32>
    %97 = tpu.matmul %91, %93, %cst_39 {dimension_numbers = #tpu.dot_dimension_numbers<[2], [2], [1], [1], [0, 0, 0, 1, 1, 1], [0], [0]>} : vector<1x8x4xf32>, vector<1x8x4xf32>, vector<1x8x8xf32> -> vector<1x8x8xf32>
    "tpu.trace_stop"() : () -> ()
    %98 = arith.addf %96, %97 : vector<1x8x8xf32>
    %cst_40 = arith.constant 5.000000e-01 : f32
    %99 = vector.broadcast %cst_40 : f32 to vector<1x8x8xf32>
    %100 = arith.mulf %98, %99 : vector<1x8x8xf32>
    %cst_41 = arith.constant dense<0xFF800000> : vector<1x8xf32>
    %101 = vector.multi_reduction <maximumf>, %100, %cst_41 [2] : vector<1x8x8xf32> to vector<1x8xf32>
    %102 = vector.shape_cast %101 : vector<1x8xf32> to vector<1x8x1xf32>
    %103 = vector.broadcast %102 : vector<1x8x1xf32> to vector<1x8x8xf32>
    %104 = arith.subf %100, %103 : vector<1x8x8xf32>
    %105 = math.exp %104 : vector<1x8x8xf32>
    %cst_42 = arith.constant dense<0.000000e+00> : vector<1x8xf32>
    %106 = vector.multi_reduction <add>, %105, %cst_42 [2] : vector<1x8x8xf32> to vector<1x8xf32>
    %107 = vector.shape_cast %106 : vector<1x8xf32> to vector<1x8x1xf32>
    %108 = tpu.reciprocal %107 {approx = true} : vector<1x8x1xf32> -> vector<1x8x1xf32>
    %109 = vector.broadcast %108 : vector<1x8x1xf32> to vector<1x8x8xf32>
    %110 = arith.mulf %105, %109 : vector<1x8x8xf32>
    "tpu.trace_start"() <{level = 10 : i32, message = "bij,bjd->bid"}> : () -> ()
    %cst_43 = arith.constant dense<0.000000e+00> : vector<1x8x4xf32>
    %111 = tpu.matmul %110, %89, %cst_43 {dimension_numbers = #tpu.dot_dimension_numbers<[2], [1], [1], [2], [0, 0, 0, 1, 1, 2], [0], [0]>} : vector<1x8x8xf32>, vector<1x8x4xf32>, vector<1x8x4xf32> -> vector<1x8x4xf32>
    %cst_44 = arith.constant dense<0.000000e+00> : vector<1x8x4xf32>
    %112 = tpu.matmul %110, %95, %cst_44 {dimension_numbers = #tpu.dot_dimension_numbers<[2], [1], [1], [2], [0, 0, 0, 1, 1, 2], [0], [0]>} : vector<1x8x8xf32>, vector<1x8x4xf32>, vector<1x8x4xf32> -> vector<1x8x4xf32>
    "tpu.trace_stop"() : () -> ()
    %113 = vector.shape_cast %111 : vector<1x8x4xf32> to vector<8x4xf32>
    %c0_45 = arith.constant 0 : index
    %c8 = arith.constant 8 : index
    %114 = vector.load %arg8[%c0_45, %c8] : memref<8x32xf32, #tpu.memory_space<vmem>>, vector<8x4xf32>
    tpu.vector_store %arg8[%c0_45, %c8], %113 {strides = array<i32>} : memref<8x32xf32, #tpu.memory_space<vmem>>, vector<8x4xf32>,
    %115 = vector.shape_cast %112 : vector<1x8x4xf32> to vector<8x4xf32>
    %c0_46 = arith.constant 0 : index
    %c8_47 = arith.constant 8 : index
    %116 = vector.load %arg9[%c0_46, %c8_47] : memref<8x32xf32, #tpu.memory_space<vmem>>, vector<8x4xf32>
    tpu.vector_store %arg9[%c0_46, %c8_47], %115 {strides = array<i32>} : memref<8x32xf32, #tpu.memory_space<vmem>>, vector<8x4xf32>,
    %117 = vector.extract_strided_slice %10 {offsets = [0, 12], sizes = [8, 4], strides = [1, 1]} : vector<8x96xf32> to vector<8x4xf32>
    %118 = vector.shape_cast %117 : vector<8x4xf32> to vector<1x8x4xf32>
    %119 = vector.extract_strided_slice %10 {offsets = [0, 44], sizes = [8, 4], strides = [1, 1]} : vector<8x96xf32> to vector<8x4xf32>
    %120 = vector.shape_cast %119 : vector<8x4xf32> to vector<1x8x4xf32>
    %121 = vector.extract_strided_slice %10 {offsets = [0, 76], sizes = [8, 4], strides = [1, 1]} : vector<8x96xf32> to vector<8x4xf32>
    %122 = vector.shape_cast %121 : vector<8x4xf32> to vector<1x8x4xf32>
    %123 = vector.extract_strided_slice %17 {offsets = [0, 12], sizes = [8, 4], strides = [1, 1]} : vector<8x96xf32> to vector<8x4xf32>
    %124 = vector.shape_cast %123 : vector<8x4xf32> to vector<1x8x4xf32>
    %125 = vector.extract_strided_slice %17 {offsets = [0, 44], sizes = [8, 4], strides = [1, 1]} : vector<8x96xf32> to vector<8x4xf32>
    %126 = vector.shape_cast %125 : vector<8x4xf32> to vector<1x8x4xf32>
    %127 = vector.extract_strided_slice %17 {offsets = [0, 76], sizes = [8, 4], strides = [1, 1]} : vector<8x96xf32> to vector<8x4xf32>
    %128 = vector.shape_cast %127 : vector<8x4xf32> to vector<1x8x4xf32>
    "tpu.trace_start"() <{level = 10 : i32, message = "bid,bjd->bij"}> : () -> ()
    %cst_48 = arith.constant dense<0.000000e+00> : vector<1x8x8xf32>
    %129 = tpu.matmul %118, %120, %cst_48 {dimension_numbers = #tpu.dot_dimension_numbers<[2], [2], [1], [1], [0, 0, 0, 1, 1, 1], [0], [0]>} : vector<1x8x4xf32>, vector<1x8x4xf32>, vector<1x8x8xf32> -> vector<1x8x8xf32>
    %cst_49 = arith.constant dense<0.000000e+00> : vector<1x8x8xf32>
    %130 = tpu.matmul %124, %126, %cst_49 {dimension_numbers = #tpu.dot_dimension_numbers<[2], [2], [1], [1], [0, 0, 0, 1, 1, 1], [0], [0]>} : vector<1x8x4xf32>, vector<1x8x4xf32>, vector<1x8x8xf32> -> vector<1x8x8xf32>
    "tpu.trace_stop"() : () -> ()
    %131 = arith.addf %129, %130 : vector<1x8x8xf32>
    %cst_50 = arith.constant 5.000000e-01 : f32
    %132 = vector.broadcast %cst_50 : f32 to vector<1x8x8xf32>
    %133 = arith.mulf %131, %132 : vector<1x8x8xf32>
    %cst_51 = arith.constant dense<0xFF800000> : vector<1x8xf32>
    %134 = vector.multi_reduction <maximumf>, %133, %cst_51 [2] : vector<1x8x8xf32> to vector<1x8xf32>
    %135 = vector.shape_cast %134 : vector<1x8xf32> to vector<1x8x1xf32>
    %136 = vector.broadcast %135 : vector<1x8x1xf32> to vector<1x8x8xf32>
    %137 = arith.subf %133, %136 : vector<1x8x8xf32>
    %138 = math.exp %137 : vector<1x8x8xf32>
    %cst_52 = arith.constant dense<0.000000e+00> : vector<1x8xf32>
    %139 = vector.multi_reduction <add>, %138, %cst_52 [2] : vector<1x8x8xf32> to vector<1x8xf32>
    %140 = vector.shape_cast %139 : vector<1x8xf32> to vector<1x8x1xf32>
    %141 = tpu.reciprocal %140 {approx = true} : vector<1x8x1xf32> -> vector<1x8x1xf32>
    %142 = vector.broadcast %141 : vector<1x8x1xf32> to vector<1x8x8xf32>
    %143 = arith.mulf %138, %142 : vector<1x8x8xf32>
    "tpu.trace_start"() <{level = 10 : i32, message = "bij,bjd->bid"}> : () -> ()
    %cst_53 = arith.constant dense<0.000000e+00> : vector<1x8x4xf32>
    %144 = tpu.matmul %143, %122, %cst_53 {dimension_numbers = #tpu.dot_dimension_numbers<[2], [1], [1], [2], [0, 0, 0, 1, 1, 2], [0], [0]>} : vector<1x8x8xf32>, vector<1x8x4xf32>, vector<1x8x4xf32> -> vector<1x8x4xf32>
    %cst_54 = arith.constant dense<0.000000e+00> : vector<1x8x4xf32>
    %145 = tpu.matmul %143, %128, %cst_54 {dimension_numbers = #tpu.dot_dimension_numbers<[2], [1], [1], [2], [0, 0, 0, 1, 1, 2], [0], [0]>} : vector<1x8x8xf32>, vector<1x8x4xf32>, vector<1x8x4xf32> -> vector<1x8x4xf32>
    "tpu.trace_stop"() : () -> ()
    %146 = vector.shape_cast %144 : vector<1x8x4xf32> to vector<8x4xf32>
    %c0_55 = arith.constant 0 : index
    %c12 = arith.constant 12 : index
    %147 = vector.load %arg8[%c0_55, %c12] : memref<8x32xf32, #tpu.memory_space<vmem>>, vector<8x4xf32>
    tpu.vector_store %arg8[%c0_55, %c12], %146 {strides = array<i32>} : memref<8x32xf32, #tpu.memory_space<vmem>>, vector<8x4xf32>,
    %148 = vector.shape_cast %145 : vector<1x8x4xf32> to vector<8x4xf32>
    %c0_56 = arith.constant 0 : index
    %c12_57 = arith.constant 12 : index
    %149 = vector.load %arg9[%c0_56, %c12_57] : memref<8x32xf32, #tpu.memory_space<vmem>>, vector<8x4xf32>
    tpu.vector_store %arg9[%c0_56, %c12_57], %148 {strides = array<i32>} : memref<8x32xf32, #tpu.memory_space<vmem>>, vector<8x4xf32>,
    %150 = vector.extract_strided_slice %10 {offsets = [0, 16], sizes = [8, 4], strides = [1, 1]} : vector<8x96xf32> to vector<8x4xf32>
    %151 = vector.shape_cast %150 : vector<8x4xf32> to vector<1x8x4xf32>
    %152 = vector.extract_strided_slice %10 {offsets = [0, 48], sizes = [8, 4], strides = [1, 1]} : vector<8x96xf32> to vector<8x4xf32>
    %153 = vector.shape_cast %152 : vector<8x4xf32> to vector<1x8x4xf32>
    %154 = vector.extract_strided_slice %10 {offsets = [0, 80], sizes = [8, 4], strides = [1, 1]} : vector<8x96xf32> to vector<8x4xf32>
    %155 = vector.shape_cast %154 : vector<8x4xf32> to vector<1x8x4xf32>
    %156 = vector.extract_strided_slice %17 {offsets = [0, 16], sizes = [8, 4], strides = [1, 1]} : vector<8x96xf32> to vector<8x4xf32>
    %157 = vector.shape_cast %156 : vector<8x4xf32> to vector<1x8x4xf32>
    %158 = vector.extract_strided_slice %17 {offsets = [0, 48], sizes = [8, 4], strides = [1, 1]} : vector<8x96xf32> to vector<8x4xf32>
    %159 = vector.shape_cast %158 : vector<8x4xf32> to vector<1x8x4xf32>
    %160 = vector.extract_strided_slice %17 {offsets = [0, 80], sizes = [8, 4], strides = [1, 1]} : vector<8x96xf32> to vector<8x4xf32>
    %161 = vector.shape_cast %160 : vector<8x4xf32> to vector<1x8x4xf32>
    "tpu.trace_start"() <{level = 10 : i32, message = "bid,bjd->bij"}> : () -> ()
    %cst_58 = arith.constant dense<0.000000e+00> : vector<1x8x8xf32>
    %162 = tpu.matmul %151, %153, %cst_58 {dimension_numbers = #tpu.dot_dimension_numbers<[2], [2], [1], [1], [0, 0, 0, 1, 1, 1], [0], [0]>} : vector<1x8x4xf32>, vector<1x8x4xf32>, vector<1x8x8xf32> -> vector<1x8x8xf32>
    %cst_59 = arith.constant dense<0.000000e+00> : vector<1x8x8xf32>
    %163 = tpu.matmul %157, %159, %cst_59 {dimension_numbers = #tpu.dot_dimension_numbers<[2], [2], [1], [1], [0, 0, 0, 1, 1, 1], [0], [0]>} : vector<1x8x4xf32>, vector<1x8x4xf32>, vector<1x8x8xf32> -> vector<1x8x8xf32>
    "tpu.trace_stop"() : () -> ()
    %164 = arith.addf %162, %163 : vector<1x8x8xf32>
    %cst_60 = arith.constant 5.000000e-01 : f32
    %165 = vector.broadcast %cst_60 : f32 to vector<1x8x8xf32>
    %166 = arith.mulf %164, %165 : vector<1x8x8xf32>
    %cst_61 = arith.constant dense<0xFF800000> : vector<1x8xf32>
    %167 = vector.multi_reduction <maximumf>, %166, %cst_61 [2] : vector<1x8x8xf32> to vector<1x8xf32>
    %168 = vector.shape_cast %167 : vector<1x8xf32> to vector<1x8x1xf32>
    %169 = vector.broadcast %168 : vector<1x8x1xf32> to vector<1x8x8xf32>
    %170 = arith.subf %166, %169 : vector<1x8x8xf32>
    %171 = math.exp %170 : vector<1x8x8xf32>
    %cst_62 = arith.constant dense<0.000000e+00> : vector<1x8xf32>
    %172 = vector.multi_reduction <add>, %171, %cst_62 [2] : vector<1x8x8xf32> to vector<1x8xf32>
    %173 = vector.shape_cast %172 : vector<1x8xf32> to vector<1x8x1xf32>
    %174 = tpu.reciprocal %173 {approx = true} : vector<1x8x1xf32> -> vector<1x8x1xf32>
    %175 = vector.broadcast %174 : vector<1x8x1xf32> to vector<1x8x8xf32>
    %176 = arith.mulf %171, %175 : vector<1x8x8xf32>
    "tpu.trace_start"() <{level = 10 : i32, message = "bij,bjd->bid"}> : () -> ()
    %cst_63 = arith.constant dense<0.000000e+00> : vector<1x8x4xf32>
    %177 = tpu.matmul %176, %155, %cst_63 {dimension_numbers = #tpu.dot_dimension_numbers<[2], [1], [1], [2], [0, 0, 0, 1, 1, 2], [0], [0]>} : vector<1x8x8xf32>, vector<1x8x4xf32>, vector<1x8x4xf32> -> vector<1x8x4xf32>
    %cst_64 = arith.constant dense<0.000000e+00> : vector<1x8x4xf32>
    %178 = tpu.matmul %176, %161, %cst_64 {dimension_numbers = #tpu.dot_dimension_numbers<[2], [1], [1], [2], [0, 0, 0, 1, 1, 2], [0], [0]>} : vector<1x8x8xf32>, vector<1x8x4xf32>, vector<1x8x4xf32> -> vector<1x8x4xf32>
    "tpu.trace_stop"() : () -> ()
    %179 = vector.shape_cast %177 : vector<1x8x4xf32> to vector<8x4xf32>
    %c0_65 = arith.constant 0 : index
    %c16 = arith.constant 16 : index
    %180 = vector.load %arg8[%c0_65, %c16] : memref<8x32xf32, #tpu.memory_space<vmem>>, vector<8x4xf32>
    tpu.vector_store %arg8[%c0_65, %c16], %179 {strides = array<i32>} : memref<8x32xf32, #tpu.memory_space<vmem>>, vector<8x4xf32>,
    %181 = vector.shape_cast %178 : vector<1x8x4xf32> to vector<8x4xf32>
    %c0_66 = arith.constant 0 : index
    %c16_67 = arith.constant 16 : index
    %182 = vector.load %arg9[%c0_66, %c16_67] : memref<8x32xf32, #tpu.memory_space<vmem>>, vector<8x4xf32>
    tpu.vector_store %arg9[%c0_66, %c16_67], %181 {strides = array<i32>} : memref<8x32xf32, #tpu.memory_space<vmem>>, vector<8x4xf32>,
    %183 = vector.extract_strided_slice %10 {offsets = [0, 20], sizes = [8, 4], strides = [1, 1]} : vector<8x96xf32> to vector<8x4xf32>
    %184 = vector.shape_cast %183 : vector<8x4xf32> to vector<1x8x4xf32>
    %185 = vector.extract_strided_slice %10 {offsets = [0, 52], sizes = [8, 4], strides = [1, 1]} : vector<8x96xf32> to vector<8x4xf32>
    %186 = vector.shape_cast %185 : vector<8x4xf32> to vector<1x8x4xf32>
    %187 = vector.extract_strided_slice %10 {offsets = [0, 84], sizes = [8, 4], strides = [1, 1]} : vector<8x96xf32> to vector<8x4xf32>
    %188 = vector.shape_cast %187 : vector<8x4xf32> to vector<1x8x4xf32>
    %189 = vector.extract_strided_slice %17 {offsets = [0, 20], sizes = [8, 4], strides = [1, 1]} : vector<8x96xf32> to vector<8x4xf32>
    %190 = vector.shape_cast %189 : vector<8x4xf32> to vector<1x8x4xf32>
    %191 = vector.extract_strided_slice %17 {offsets = [0, 52], sizes = [8, 4], strides = [1, 1]} : vector<8x96xf32> to vector<8x4xf32>
    %192 = vector.shape_cast %191 : vector<8x4xf32> to vector<1x8x4xf32>
    %193 = vector.extract_strided_slice %17 {offsets = [0, 84], sizes = [8, 4], strides = [1, 1]} : vector<8x96xf32> to vector<8x4xf32>
    %194 = vector.shape_cast %193 : vector<8x4xf32> to vector<1x8x4xf32>
    "tpu.trace_start"() <{level = 10 : i32, message = "bid,bjd->bij"}> : () -> ()
    %cst_68 = arith.constant dense<0.000000e+00> : vector<1x8x8xf32>
    %195 = tpu.matmul %184, %186, %cst_68 {dimension_numbers = #tpu.dot_dimension_numbers<[2], [2], [1], [1], [0, 0, 0, 1, 1, 1], [0], [0]>} : vector<1x8x4xf32>, vector<1x8x4xf32>, vector<1x8x8xf32> -> vector<1x8x8xf32>
    %cst_69 = arith.constant dense<0.000000e+00> : vector<1x8x8xf32>
    %196 = tpu.matmul %190, %192, %cst_69 {dimension_numbers = #tpu.dot_dimension_numbers<[2], [2], [1], [1], [0, 0, 0, 1, 1, 1], [0], [0]>} : vector<1x8x4xf32>, vector<1x8x4xf32>, vector<1x8x8xf32> -> vector<1x8x8xf32>
    "tpu.trace_stop"() : () -> ()
    %197 = arith.addf %195, %196 : vector<1x8x8xf32>
    %cst_70 = arith.constant 5.000000e-01 : f32
    %198 = vector.broadcast %cst_70 : f32 to vector<1x8x8xf32>
    %199 = arith.mulf %197, %198 : vector<1x8x8xf32>
    %cst_71 = arith.constant dense<0xFF800000> : vector<1x8xf32>
    %200 = vector.multi_reduction <maximumf>, %199, %cst_71 [2] : vector<1x8x8xf32> to vector<1x8xf32>
    %201 = vector.shape_cast %200 : vector<1x8xf32> to vector<1x8x1xf32>
    %202 = vector.broadcast %201 : vector<1x8x1xf32> to vector<1x8x8xf32>
    %203 = arith.subf %199, %202 : vector<1x8x8xf32>
    %204 = math.exp %203 : vector<1x8x8xf32>
    %cst_72 = arith.constant dense<0.000000e+00> : vector<1x8xf32>
    %205 = vector.multi_reduction <add>, %204, %cst_72 [2] : vector<1x8x8xf32> to vector<1x8xf32>
    %206 = vector.shape_cast %205 : vector<1x8xf32> to vector<1x8x1xf32>
    %207 = tpu.reciprocal %206 {approx = true} : vector<1x8x1xf32> -> vector<1x8x1xf32>
    %208 = vector.broadcast %207 : vector<1x8x1xf32> to vector<1x8x8xf32>
    %209 = arith.mulf %204, %208 : vector<1x8x8xf32>
    "tpu.trace_start"() <{level = 10 : i32, message = "bij,bjd->bid"}> : () -> ()
    %cst_73 = arith.constant dense<0.000000e+00> : vector<1x8x4xf32>
    %210 = tpu.matmul %209, %188, %cst_73 {dimension_numbers = #tpu.dot_dimension_numbers<[2], [1], [1], [2], [0, 0, 0, 1, 1, 2], [0], [0]>} : vector<1x8x8xf32>, vector<1x8x4xf32>, vector<1x8x4xf32> -> vector<1x8x4xf32>
    %cst_74 = arith.constant dense<0.000000e+00> : vector<1x8x4xf32>
    %211 = tpu.matmul %209, %194, %cst_74 {dimension_numbers = #tpu.dot_dimension_numbers<[2], [1], [1], [2], [0, 0, 0, 1, 1, 2], [0], [0]>} : vector<1x8x8xf32>, vector<1x8x4xf32>, vector<1x8x4xf32> -> vector<1x8x4xf32>
    "tpu.trace_stop"() : () -> ()
    %212 = vector.shape_cast %210 : vector<1x8x4xf32> to vector<8x4xf32>
    %c0_75 = arith.constant 0 : index
    %c20 = arith.constant 20 : index
    %213 = vector.load %arg8[%c0_75, %c20] : memref<8x32xf32, #tpu.memory_space<vmem>>, vector<8x4xf32>
    tpu.vector_store %arg8[%c0_75, %c20], %212 {strides = array<i32>} : memref<8x32xf32, #tpu.memory_space<vmem>>, vector<8x4xf32>,
    %214 = vector.shape_cast %211 : vector<1x8x4xf32> to vector<8x4xf32>
    %c0_76 = arith.constant 0 : index
    %c20_77 = arith.constant 20 : index
    %215 = vector.load %arg9[%c0_76, %c20_77] : memref<8x32xf32, #tpu.memory_space<vmem>>, vector<8x4xf32>
    tpu.vector_store %arg9[%c0_76, %c20_77], %214 {strides = array<i32>} : memref<8x32xf32, #tpu.memory_space<vmem>>, vector<8x4xf32>,
    %216 = vector.extract_strided_slice %10 {offsets = [0, 24], sizes = [8, 4], strides = [1, 1]} : vector<8x96xf32> to vector<8x4xf32>
    %217 = vector.shape_cast %216 : vector<8x4xf32> to vector<1x8x4xf32>
    %218 = vector.extract_strided_slice %10 {offsets = [0, 56], sizes = [8, 4], strides = [1, 1]} : vector<8x96xf32> to vector<8x4xf32>
    %219 = vector.shape_cast %218 : vector<8x4xf32> to vector<1x8x4xf32>
    %220 = vector.extract_strided_slice %10 {offsets = [0, 88], sizes = [8, 4], strides = [1, 1]} : vector<8x96xf32> to vector<8x4xf32>
    %221 = vector.shape_cast %220 : vector<8x4xf32> to vector<1x8x4xf32>
    %222 = vector.extract_strided_slice %17 {offsets = [0, 24], sizes = [8, 4], strides = [1, 1]} : vector<8x96xf32> to vector<8x4xf32>
    %223 = vector.shape_cast %222 : vector<8x4xf32> to vector<1x8x4xf32>
    %224 = vector.extract_strided_slice %17 {offsets = [0, 56], sizes = [8, 4], strides = [1, 1]} : vector<8x96xf32> to vector<8x4xf32>
    %225 = vector.shape_cast %224 : vector<8x4xf32> to vector<1x8x4xf32>
    %226 = vector.extract_strided_slice %17 {offsets = [0, 88], sizes = [8, 4], strides = [1, 1]} : vector<8x96xf32> to vector<8x4xf32>
    %227 = vector.shape_cast %226 : vector<8x4xf32> to vector<1x8x4xf32>
    "tpu.trace_start"() <{level = 10 : i32, message = "bid,bjd->bij"}> : () -> ()
    %cst_78 = arith.constant dense<0.000000e+00> : vector<1x8x8xf32>
    %228 = tpu.matmul %217, %219, %cst_78 {dimension_numbers = #tpu.dot_dimension_numbers<[2], [2], [1], [1], [0, 0, 0, 1, 1, 1], [0], [0]>} : vector<1x8x4xf32>, vector<1x8x4xf32>, vector<1x8x8xf32> -> vector<1x8x8xf32>
    %cst_79 = arith.constant dense<0.000000e+00> : vector<1x8x8xf32>
    %229 = tpu.matmul %223, %225, %cst_79 {dimension_numbers = #tpu.dot_dimension_numbers<[2], [2], [1], [1], [0, 0, 0, 1, 1, 1], [0], [0]>} : vector<1x8x4xf32>, vector<1x8x4xf32>, vector<1x8x8xf32> -> vector<1x8x8xf32>
    "tpu.trace_stop"() : () -> ()
    %230 = arith.addf %228, %229 : vector<1x8x8xf32>
    %cst_80 = arith.constant 5.000000e-01 : f32
    %231 = vector.broadcast %cst_80 : f32 to vector<1x8x8xf32>
    %232 = arith.mulf %230, %231 : vector<1x8x8xf32>
    %cst_81 = arith.constant dense<0xFF800000> : vector<1x8xf32>
    %233 = vector.multi_reduction <maximumf>, %232, %cst_81 [2] : vector<1x8x8xf32> to vector<1x8xf32>
    %234 = vector.shape_cast %233 : vector<1x8xf32> to vector<1x8x1xf32>
    %235 = vector.broadcast %234 : vector<1x8x1xf32> to vector<1x8x8xf32>
    %236 = arith.subf %232, %235 : vector<1x8x8xf32>
    %237 = math.exp %236 : vector<1x8x8xf32>
    %cst_82 = arith.constant dense<0.000000e+00> : vector<1x8xf32>
    %238 = vector.multi_reduction <add>, %237, %cst_82 [2] : vector<1x8x8xf32> to vector<1x8xf32>
    %239 = vector.shape_cast %238 : vector<1x8xf32> to vector<1x8x1xf32>
    %240 = tpu.reciprocal %239 {approx = true} : vector<1x8x1xf32> -> vector<1x8x1xf32>
    %241 = vector.broadcast %240 : vector<1x8x1xf32> to vector<1x8x8xf32>
    %242 = arith.mulf %237, %241 : vector<1x8x8xf32>
    "tpu.trace_start"() <{level = 10 : i32, message = "bij,bjd->bid"}> : () -> ()
    %cst_83 = arith.constant dense<0.000000e+00> : vector<1x8x4xf32>
    %243 = tpu.matmul %242, %221, %cst_83 {dimension_numbers = #tpu.dot_dimension_numbers<[2], [1], [1], [2], [0, 0, 0, 1, 1, 2], [0], [0]>} : vector<1x8x8xf32>, vector<1x8x4xf32>, vector<1x8x4xf32> -> vector<1x8x4xf32>
    %cst_84 = arith.constant dense<0.000000e+00> : vector<1x8x4xf32>
    %244 = tpu.matmul %242, %227, %cst_84 {dimension_numbers = #tpu.dot_dimension_numbers<[2], [1], [1], [2], [0, 0, 0, 1, 1, 2], [0], [0]>} : vector<1x8x8xf32>, vector<1x8x4xf32>, vector<1x8x4xf32> -> vector<1x8x4xf32>
    "tpu.trace_stop"() : () -> ()
    %245 = vector.shape_cast %243 : vector<1x8x4xf32> to vector<8x4xf32>
    %c0_85 = arith.constant 0 : index
    %c24 = arith.constant 24 : index
    %246 = vector.load %arg8[%c0_85, %c24] : memref<8x32xf32, #tpu.memory_space<vmem>>, vector<8x4xf32>
    tpu.vector_store %arg8[%c0_85, %c24], %245 {strides = array<i32>} : memref<8x32xf32, #tpu.memory_space<vmem>>, vector<8x4xf32>,
    %247 = vector.shape_cast %244 : vector<1x8x4xf32> to vector<8x4xf32>
    %c0_86 = arith.constant 0 : index
    %c24_87 = arith.constant 24 : index
    %248 = vector.load %arg9[%c0_86, %c24_87] : memref<8x32xf32, #tpu.memory_space<vmem>>, vector<8x4xf32>
    tpu.vector_store %arg9[%c0_86, %c24_87], %247 {strides = array<i32>} : memref<8x32xf32, #tpu.memory_space<vmem>>, vector<8x4xf32>,
    %249 = vector.extract_strided_slice %10 {offsets = [0, 28], sizes = [8, 4], strides = [1, 1]} : vector<8x96xf32> to vector<8x4xf32>
    %250 = vector.shape_cast %249 : vector<8x4xf32> to vector<1x8x4xf32>
    %251 = vector.extract_strided_slice %10 {offsets = [0, 60], sizes = [8, 4], strides = [1, 1]} : vector<8x96xf32> to vector<8x4xf32>
    %252 = vector.shape_cast %251 : vector<8x4xf32> to vector<1x8x4xf32>
    %253 = vector.extract_strided_slice %10 {offsets = [0, 92], sizes = [8, 4], strides = [1, 1]} : vector<8x96xf32> to vector<8x4xf32>
    %254 = vector.shape_cast %253 : vector<8x4xf32> to vector<1x8x4xf32>
    %255 = vector.extract_strided_slice %17 {offsets = [0, 28], sizes = [8, 4], strides = [1, 1]} : vector<8x96xf32> to vector<8x4xf32>
    %256 = vector.shape_cast %255 : vector<8x4xf32> to vector<1x8x4xf32>
    %257 = vector.extract_strided_slice %17 {offsets = [0, 60], sizes = [8, 4], strides = [1, 1]} : vector<8x96xf32> to vector<8x4xf32>
    %258 = vector.shape_cast %257 : vector<8x4xf32> to vector<1x8x4xf32>
    %259 = vector.extract_strided_slice %17 {offsets = [0, 92], sizes = [8, 4], strides = [1, 1]} : vector<8x96xf32> to vector<8x4xf32>
    %260 = vector.shape_cast %259 : vector<8x4xf32> to vector<1x8x4xf32>
    "tpu.trace_start"() <{level = 10 : i32, message = "bid,bjd->bij"}> : () -> ()
    %cst_88 = arith.constant dense<0.000000e+00> : vector<1x8x8xf32>
    %261 = tpu.matmul %250, %252, %cst_88 {dimension_numbers = #tpu.dot_dimension_numbers<[2], [2], [1], [1], [0, 0, 0, 1, 1, 1], [0], [0]>} : vector<1x8x4xf32>, vector<1x8x4xf32>, vector<1x8x8xf32> -> vector<1x8x8xf32>
    %cst_89 = arith.constant dense<0.000000e+00> : vector<1x8x8xf32>
    %262 = tpu.matmul %256, %258, %cst_89 {dimension_numbers = #tpu.dot_dimension_numbers<[2], [2], [1], [1], [0, 0, 0, 1, 1, 1], [0], [0]>} : vector<1x8x4xf32>, vector<1x8x4xf32>, vector<1x8x8xf32> -> vector<1x8x8xf32>
    "tpu.trace_stop"() : () -> ()
    %263 = arith.addf %261, %262 : vector<1x8x8xf32>
    %cst_90 = arith.constant 5.000000e-01 : f32
    %264 = vector.broadcast %cst_90 : f32 to vector<1x8x8xf32>
    %265 = arith.mulf %263, %264 : vector<1x8x8xf32>
    %cst_91 = arith.constant dense<0xFF800000> : vector<1x8xf32>
    %266 = vector.multi_reduction <maximumf>, %265, %cst_91 [2] : vector<1x8x8xf32> to vector<1x8xf32>
    %267 = vector.shape_cast %266 : vector<1x8xf32> to vector<1x8x1xf32>
    %268 = vector.broadcast %267 : vector<1x8x1xf32> to vector<1x8x8xf32>
    %269 = arith.subf %265, %268 : vector<1x8x8xf32>
    %270 = math.exp %269 : vector<1x8x8xf32>
    %cst_92 = arith.constant dense<0.000000e+00> : vector<1x8xf32>
    %271 = vector.multi_reduction <add>, %270, %cst_92 [2] : vector<1x8x8xf32> to vector<1x8xf32>
    %272 = vector.shape_cast %271 : vector<1x8xf32> to vector<1x8x1xf32>
    %273 = tpu.reciprocal %272 {approx = true} : vector<1x8x1xf32> -> vector<1x8x1xf32>
    %274 = vector.broadcast %273 : vector<1x8x1xf32> to vector<1x8x8xf32>
    %275 = arith.mulf %270, %274 : vector<1x8x8xf32>
    "tpu.trace_start"() <{level = 10 : i32, message = "bij,bjd->bid"}> : () -> ()
    %cst_93 = arith.constant dense<0.000000e+00> : vector<1x8x4xf32>
    %276 = tpu.matmul %275, %254, %cst_93 {dimension_numbers = #tpu.dot_dimension_numbers<[2], [1], [1], [2], [0, 0, 0, 1, 1, 2], [0], [0]>} : vector<1x8x8xf32>, vector<1x8x4xf32>, vector<1x8x4xf32> -> vector<1x8x4xf32>
    %cst_94 = arith.constant dense<0.000000e+00> : vector<1x8x4xf32>
    %277 = tpu.matmul %275, %260, %cst_94 {dimension_numbers = #tpu.dot_dimension_numbers<[2], [1], [1], [2], [0, 0, 0, 1, 1, 2], [0], [0]>} : vector<1x8x8xf32>, vector<1x8x4xf32>, vector<1x8x4xf32> -> vector<1x8x4xf32>
    "tpu.trace_stop"() : () -> ()
    %278 = vector.shape_cast %276 : vector<1x8x4xf32> to vector<8x4xf32>
    %c0_95 = arith.constant 0 : index
    %c28 = arith.constant 28 : index
    %279 = vector.load %arg8[%c0_95, %c28] : memref<8x32xf32, #tpu.memory_space<vmem>>, vector<8x4xf32>
    tpu.vector_store %arg8[%c0_95, %c28], %278 {strides = array<i32>} : memref<8x32xf32, #tpu.memory_space<vmem>>, vector<8x4xf32>,
    %280 = vector.shape_cast %277 : vector<1x8x4xf32> to vector<8x4xf32>
    %c0_96 = arith.constant 0 : index
    %c28_97 = arith.constant 28 : index
    %281 = vector.load %arg9[%c0_96, %c28_97] : memref<8x32xf32, #tpu.memory_space<vmem>>, vector<8x4xf32>
    tpu.vector_store %arg9[%c0_96, %c28_97], %280 {strides = array<i32>} : memref<8x32xf32, #tpu.memory_space<vmem>>, vector<8x4xf32>,
    %c0_98 = arith.constant 0 : index
    %c0_99 = arith.constant 0 : index
    %282 = vector.load %arg8[%c0_98, %c0_99] : memref<8x32xf32, #tpu.memory_space<vmem>>, vector<8x32xf32>
    %c0_100 = arith.constant 0 : index
    %c0_101 = arith.constant 0 : index
    %c0_102 = arith.constant 0 : index
    %283 = vector.load %arg5[%c0_100, %c0_101, %c0_102] : memref<2x32x64xf32, #tpu.memory_space<vmem>>, vector<1x32x64xf32>
    %284 = vector.shape_cast %283 : vector<1x32x64xf32> to vector<32x64xf32>
    %cst_103 = arith.constant dense<0.000000e+00> : vector<8x64xf32>
    %285 = tpu.matmul %282, %284, %cst_103 {dimension_numbers = #tpu.dot_dimension_numbers<[1], [0], [0], [1], [0, 0, 1, 1], [], []>} : vector<8x32xf32>, vector<32x64xf32>, vector<8x64xf32> -> vector<8x64xf32>
    %c0_104 = arith.constant 0 : index
    %c0_105 = arith.constant 0 : index
    %286 = vector.load %arg9[%c0_104, %c0_105] : memref<8x32xf32, #tpu.memory_space<vmem>>, vector<8x32xf32>
    %c1_106 = arith.constant 1 : index
    %c0_107 = arith.constant 0 : index
    %c0_108 = arith.constant 0 : index
    %287 = vector.load %arg5[%c1_106, %c0_107, %c0_108] : memref<2x32x64xf32, #tpu.memory_space<vmem>>, vector<1x32x64xf32>
    %288 = vector.shape_cast %287 : vector<1x32x64xf32> to vector<32x64xf32>
    %cst_109 = arith.constant dense<0.000000e+00> : vector<8x64xf32>
    %289 = tpu.matmul %286, %288, %cst_109 {dimension_numbers = #tpu.dot_dimension_numbers<[1], [0], [0], [1], [0, 0, 1, 1], [], []>} : vector<8x32xf32>, vector<32x64xf32>, vector<8x64xf32> -> vector<8x64xf32>
    %290 = arith.addf %285, %289 : vector<8x64xf32>
    %c0_110 = arith.constant 0 : index
    %c0_111 = arith.constant 0 : index
    %291 = vector.load %arg6[%c0_110, %c0_111] : memref<1x64xf32, #tpu.memory_space<vmem>>, vector<1x64xf32>
    %292 = vector.broadcast %291 : vector<1x64xf32> to vector<8x64xf32>
    %293 = arith.addf %290, %292 : vector<8x64xf32>
    %294 = vector.shape_cast %293 : vector<8x64xf32> to vector<1x8x64xf32>
    %c0_112 = arith.constant 0 : index
    %c0_113 = arith.constant 0 : index
    %c0_114 = arith.constant 0 : index
    %295 = vector.load %arg7[%c0_112, %c0_113, %c0_114] : memref<1x8x64xf32, #tpu.memory_space<vmem>>, vector<1x8x64xf32>
    tpu.vector_store %arg7[%c0_112, %c0_113, %c0_114], %294 {strides = array<i32>} : memref<1x8x64xf32, #tpu.memory_space<vmem>>, vector<1x8x64xf32>,
    return
  }
  func.func @transform_0(%arg0: i32) -> (i32, i32, i32) {
    %c0_i32 = arith.constant 0 : i32
    %c0_i32_0 = arith.constant 0 : i32
    %c0_i32_1 = arith.constant 0 : i32
    return %arg0, %c0_i32, %c0_i32_0 : i32, i32, i32
  }
  func.func @transform_1(%arg0: i32) -> (i32, i32, i32) {
    %c0_i32 = arith.constant 0 : i32
    %c0_i32_0 = arith.constant 0 : i32
    %c0_i32_1 = arith.constant 0 : i32
    return %arg0, %c0_i32, %c0_i32_0 : i32, i32, i32
  }
  func.func @transform_2(%arg0: i32) -> (i32, i32, i32) {
    %c0_i32 = arith.constant 0 : i32
    %c0_i32_0 = arith.constant 0 : i32
    %c0_i32_1 = arith.constant 0 : i32
    %c0_i32_2 = arith.constant 0 : i32
    return %c0_i32, %c0_i32_0, %c0_i32_1 : i32, i32, i32
  }
  func.func @transform_3(%arg0: i32) -> (i32, i32, i32) {
    %c0_i32 = arith.constant 0 : i32
    %c0_i32_0 = arith.constant 0 : i32
    %c0_i32_1 = arith.constant 0 : i32
    %c0_i32_2 = arith.constant 0 : i32
    return %c0_i32, %c0_i32_0, %c0_i32_1 : i32, i32, i32
  }
  func.func @transform_4(%arg0: i32) -> (i32, i32, i32) {
    %c0_i32 = arith.constant 0 : i32
    %c0_i32_0 = arith.constant 0 : i32
    %c0_i32_1 = arith.constant 0 : i32
    %c0_i32_2 = arith.constant 0 : i32
    return %c0_i32, %c0_i32_0, %c0_i32_1 : i32, i32, i32
  }
  func.func @transform_5(%arg0: i32) -> (i32, i32) {
    %c0_i32 = arith.constant 0 : i32
    %c0_i32_0 = arith.constant 0 : i32
    %c0_i32_1 = arith.constant 0 : i32
    return %c0_i32, %c0_i32_0 : i32, i32
  }
  func.func @transform_6(%arg0: i32) -> (i32, i32, i32) {
    %c0_i32 = arith.constant 0 : i32
    %c0_i32_0 = arith.constant 0 : i32
    %c0_i32_1 = arith.constant 0 : i32
    return %arg0, %c0_i32, %c0_i32_0 : i32, i32, i32
  }
}

</mosaic_0001>

<bundles_post_ra>
// kernel: tpu_custom_call.1
= control target key start
LH: loop header
LB: loop body
LE: loop exit
PB: predicated region body
PF: predicated region fallthrough
CT: control target
= control target key end

     0   :  { %s4799_s0 = inlined_call_operand.hbm [shape: f32[2,8,32], index: 0, kind: input, shape index: {}]   ;;  %s4800_s1 = inlined_call_operand.hbm [shape: f32[2,8,32], index: 1, kind: input, shape index: {}]   ;;  %s4801_s2 = inlined_call_operand.hbm [shape: f32[2,32,96], index: 2, kind: input, shape index: {}]   ;;  %s4802_s3 = inlined_call_operand.vmem [shape: f32[2,1,96], index: 3, kind: input, shape index: {}]   ;;  %s4803_s4 = inlined_call_operand.hbm [shape: f32[2,32,64], index: 4, kind: input, shape index: {}]   ;;  %s4804_s5 = inlined_call_operand.vmem [shape: f32[1,64], index: 5, kind: input, shape index: {}]   ;;  %s4805_s6 = inlined_call_operand.hbm [shape: f32[2,8,64], index: 6, kind: output, shape index: {}]  }
   0x1   :  { %4810 = sst [smem:[#allocation19_spill]] %s4801_s2 }
   0x2   :  { %4811 = sst [smem:[#allocation20_spill]] %s4803_s4 }
   0x3   :  { %11 = vsyncpa [#allocation5], 0 }
   0x4   :  { %13 = vsyncpa [#allocation5 + $0x1], 0 }
   0x5   :  { %14 = vsyncpa [#allocation8], 0 }
   0x6   :  { %16 = vsyncpa [#allocation8 + $0x1], 0 }
   0x7   :  { %17 = vsyncpa [#allocation11], 0 }
   0x8   :  { %18 = vsyncpa [#allocation6], 0 }
   0x9   :  { %20 = vsyncpa [#allocation6 + $0x1], 0  ;;  %s4227_s21 = smov 0   ;;  %s4229_s22 = smov 0  }
   0xa   :  { %s4231_s23 = smov 0   ;;  %s4233_s24 = smov 0  }
   0xb LB: > { %s4248_s25 = sadd.s32 4294967295, %s4150_s24   ;;  %s3414_s26 = sadd.s32 4294967294, %s4150_s24   ;;  %s4150_s24 = sphi %s4233_s24, %s4835_s24   ;;  %s4146_s23 = sphi %s4231_s23, %s4834_s23   ;;  %s4142_s22 = sphi %s4229_s22, %s4833_s22   ;;  %s4138_s21 = sphi %s4227_s21, %s4832_s21  }
   0xc   : > { %p46_p0 = scmp.ne.s32.totalorder %s4142_s22, %s4138_s21  ;;  %p4806_p1 = scmp.eq.s32.totalorder %s4248_s25, 0 }
   0xd   : > { %p186_p3 = scmp.eq.s32.totalorder %s3414_s26, 1  ;;  %p3415_p5 = scmp.ge.s32.totalorder %s4150_s24, 1 }
   0xe   : > { %p4257_p4 = por %p4806_p1, %p46_p0  ;;  %p193_p7 = scmp.lt.s32.totalorder %s4150_s24, 3 }
   0xf   : > { %p4262_p6 = por %p186_p3, %p46_p0  ;;  %s4152_s30 = smov [#allocation9]  }
  0x10   : > { %s4812_s27 = scalar_select %p4257_p4, 1, 0 }
  0x11   : > { %s4813_s28 = scalar_select %p4262_p6, 1, 0 }
  0x12   : > { %p4267_p8 = pnand %p3415_p5, %p193_p7  ;;  %s205_s7 = sshll.u32 %s4152_s30, 4  ;;  %s4271_s7 = int_to_ptr.vmem [resolvable:$true] %s205_s7 }
  0x13   : > { %s4153_s9 = smov [#allocation10]   ;;  %s4816_s2 = sld [smem:[#allocation19_spill]] }
  0x14   : > { %s4814_s29 = scalar_select %p4267_p8, 1, 0 }
  0x15   : > { %p3831_p9 = pneg %p4267_p8  ;;  %s221_s10 = sshll.u32 %s4153_s9, 4  ;;  %s4282_s10 = int_to_ptr.vmem [resolvable:$true] %s221_s10 }
  0x17   : > { %p4278_p11 = pnand %p3831_p9, %p4806_p1 }
  0x19   : > { %s3956_s13 = scalar_lea.hbm %s4816_s2, 1024  ;;  %p3958_p13 = pneg %p4278_p11 }
  0x1a   : > { %p3957_p12 = scmp.ne.s32.totalorder %s4816_s2, %s3956_s13  ;;  %p3963_p5 = scmp.lt.u32.totalorder %s3956_s13, %s4816_s2 }
  0x1c   : > { %p3959_p0 = pnand %p3958_p13, %p3957_p12 }
  0x1e   : > { %p3960_p3 = pneg %p3959_p0 }
  0x20   : > { %p3965_p7 = pnand %p3963_p5, %p3960_p3 }
  0x22   : > { %3968 = shalt.err (!%p3965_p7)
}
  0x23   : > { %s3969_s18 = scalar_lea.vmem %s4271_s7, 1024  ;;  %p3977_p2 = scmp.lt.s32.totalorder %s4271_s7, %s4271_s7 }
  0x24   : > { %p3970_p9 = scmp.ne.s32.totalorder %s4271_s7, %s3969_s18  ;;  %p3978_p12 = scmp.lt.s32.totalorder %s3969_s18, %s3969_s18 }
  0x26   : > { %p3972_p10 = pnand %p3970_p9, %p3958_p13  ;;  %p3979_p0 = por %p3978_p12, %p3977_p2 }
  0x28   : > { %p3973_p1 = pneg %p3972_p10 }
  0x2a   : > { %p3980_p6 = pnand %p3979_p0, %p3973_p1 }
  0x2c   : > { %3983 = shalt.err (!%p3980_p6)
}
  0x2d   : > { %s4154_s19 = smov 128   ;;  %s4155_s20 = smov 8  }
  0x2e   : > { %3834 = dma.hbm_to_vmem [thread:$0]  (!%p4278_p11), %s4816_s2, 1024, %s4271_s7, [#allocation8], %s4154_s19, %s4154_s19, %s4155_s20  }
  0x2f   : > { %s4817_s4 = sld [smem:[#allocation20_spill]] }
  0x35   : > { %s3984_s12 = scalar_lea.hbm %s4817_s4, 1024 }
  0x36   : > { %p3985_p2 = scmp.ne.s32.totalorder %s4817_s4, %s3984_s12  ;;  %p3991_p10 = scmp.lt.u32.totalorder %s3984_s12, %s4817_s4 }
  0x38   : > { %p3987_p1 = pnand %p3985_p2, %p3958_p13 }
  0x3a   : > { %p3988_p6 = pneg %p3987_p1 }
  0x3c   : > { %p3993_p3 = pnand %p3991_p10, %p3988_p6 }
  0x3e   : > { %3996 = shalt.err (!%p3993_p3)
}
  0x3f   : > { %s3997_s7 = scalar_lea.vmem %s4282_s10, 1024  ;;  %p4005_p12 = scmp.lt.s32.totalorder %s4282_s10, %s4282_s10 }
  0x40   : > { %p3998_p5 = scmp.ne.s32.totalorder %s4282_s10, %s3997_s7  ;;  %p4006_p0 = scmp.lt.s32.totalorder %s3997_s7, %s3997_s7 }
  0x42   : > { %p4000_p7 = pnand %p3998_p5, %p3958_p13  ;;  %p4007_p2 = por %p4006_p0, %p4005_p12 }
  0x44   : > { %p4001_p9 = pneg %p4000_p7 }
  0x46   : > { %p4008_p1 = pnand %p4007_p2, %p4001_p9 }
  0x48   : > { %4011 = shalt.err (!%p4008_p1)
}
  0x49   : > { %3837 = dma.hbm_to_vmem [thread:$0]  (!%p4278_p11), %s4817_s4, 1024, %s4282_s10, [#allocation11], %s4154_s19, %s4154_s19, %s4155_s20  }
  0x4a   : > { %s4337_s26 = sadd.s32 1, %s4150_s24   ;;  %s33_s8 = sadd.s32 1, %s4146_s23 }
  0x4b   : > { %s30_s30 = ssub.s32 %s4150_s24, %s4337_s26  ;;  %p40_p13 = scmp.ne.s32.totalorder %s4146_s23, %s4142_s22 }
  0x4c   : > { %p31_p6 = scmp.eq.s32.totalorder %s30_s30, 0  ;;  %p41_p10 = scmp.eq.s32.totalorder %s4150_s24, 0 }
  0x4d   : > { %p4818_p3 = scmp.eq.s32.totalorder %s4248_s25, 1  ;;  %p3851_p7 = scmp.lt.s32.totalorder %s4150_s24, 2 }
  0x4e   : > { %s4353_s11 = scalar_select %p31_p6, %s4146_s23, %s33_s8  }
  0x4f   : > { %p4347_p5 = por %p4818_p3, %p40_p13  ;;  %p42_p9 = por %p41_p10, %p40_p13 }
  0x50   : > { %4820 = sst [smem:[#allocation18_spill]] %s4353_s11  ;;  %s238_s12 = sand.u32 1, %s4146_s23  }
  0x51   : > { %s4819_s9 = scalar_select %p4347_p5, 1, 0 }
  0x52   : > { %s4356_s10 = sshll.u32 %s238_s12, 3  ;;  %s3420_s19 = sshll.u32 %s4150_s24, 7 }
  0x53   : > { %s4362_s14 = scalar_lea.hbm %s4799_s0, %s3420_s19  ;;  %s242_s15 = scalar_lea.vmem [#allocation4], %s4356_s10 }
  0x54   : > { %s249_s16 = sshll.u32 %s242_s15, 4  ;;  %p4367_p11 = pnand %p3851_p7, %p42_p9  ;;  %s4365_s16 = int_to_ptr.vmem [resolvable:$true] %s249_s16 }
  0x55   : > { %s4374_s8 = scalar_lea.hbm %s4800_s1, %s3420_s19  ;;  %s256_s30 = sand.u32 1, %s4150_s24  }
  0x56   : > { %s239_s20 = scalar_lea.sflag [#allocation5], %s238_s12  ;;  %s4012_s13 = scalar_lea.hbm %s4362_s14, 128 }
  0x57   : > { %p4013_p12 = scmp.ne.s32.totalorder %s4362_s14, %s4012_s13  ;;  %p4014_p0 = pneg %p4367_p11 }
  0x58   : > { %s4017_s4 = scalar_lea.hbm %s4799_s0, 256  ;;  %p4018_p13 = scmp.lt.u32.totalorder %s4362_s14, %s4799_s0 }
  0x59   : > { %p4015_p2 = pnand %p4014_p0, %p4013_p12  ;;  %p4019_p6 = scmp.lt.u32.totalorder %s4017_s4, %s4012_s13 }
  0x5a   : > { %p4021_p3 = scmp.lt.u32.totalorder %s4012_s13, %s4362_s14 }
  0x5b   : > { %p4016_p1 = pneg %p4015_p2  ;;  %p4020_p10 = por %p4019_p6, %p4018_p13 }
  0x5d   : > { %p4022_p7 = por %p4021_p3, %p4020_p10 }
  0x5f   : > { %p4023_p9 = pnand %p4022_p7, %p4016_p1 }
  0x61   : > { %4026 = shalt.err (!%p4023_p9)
}
  0x62   : > { %s4027_s12 = scalar_lea.vmem %s4365_s16, 128  ;;  %s4156_s2 = smov [#allocation4]  }
  0x63   : > { %p4028_p12 = scmp.ne.s32.totalorder %s4365_s16, %s4027_s12  ;;  %s4032_s19 = sshll.u32 %s4156_s2, 4  ;;  %s4033_s19 = int_to_ptr.vmem [resolvable:$false] %s4032_s19 }
  0x64   : > { %s4034_s11 = scalar_lea.vmem %s4033_s19, 256  ;;  %p4035_p4 = scmp.lt.s32.totalorder %s4365_s16, %s4033_s19 }
  0x65   : > { %p4030_p2 = pnand %p4028_p12, %p4014_p0  ;;  %p4036_p13 = scmp.lt.s32.totalorder %s4034_s11, %s4027_s12 }
  0x67   : > { %p4031_p5 = pneg %p4030_p2  ;;  %p4037_p6 = por %p4036_p13, %p4035_p4 }
  0x69   : > { %p4038_p10 = pnand %p4037_p6, %p4031_p5 }
  0x6b   : > { %4041 = shalt.err (!%p4038_p10)
}
  0x6c   : > { %3841 = dma.hbm_to_vmem [thread:$0]  (!%p4367_p11), %s4362_s14, 128, %s4365_s16, %s239_s20  }
  0x6d   : > { %s260_s4 = scalar_lea.vmem [#allocation7], %s4356_s10  ;;  %s257_s13 = scalar_lea.sflag [#allocation8], %s256_s30 }
  0x6e   : > { %s267_s18 = sshll.u32 %s260_s4, 4  ;;  %s4042_s15 = scalar_lea.hbm %s4374_s8, 128  ;;  %s268_s18 = int_to_ptr.vmem [resolvable:$true] %s267_s18 }
  0x6f   : > { %p4043_p4 = scmp.ne.s32.totalorder %s4374_s8, %s4042_s15  ;;  %s4047_s2 = scalar_lea.hbm %s4800_s1, 256 }
  0x70   : > { %p4048_p3 = scmp.lt.u32.totalorder %s4374_s8, %s4800_s1  ;;  %p4049_p7 = scmp.lt.u32.totalorder %s4047_s2, %s4042_s15 }
  0x71   : > { %p4045_p5 = pnand %p4043_p4, %p4014_p0  ;;  %p4051_p12 = scmp.lt.u32.totalorder %s4042_s15, %s4374_s8 }
  0x72   : > { %p4050_p9 = por %p4049_p7, %p4048_p3 }
  0x73   : > { %p4046_p1 = pneg %p4045_p5 }
  0x74   : > { %p4052_p2 = por %p4051_p12, %p4050_p9 }
  0x76   : > { %p4053_p13 = pnand %p4052_p2, %p4046_p1 }
  0x78   : > { %4056 = shalt.err (!%p4053_p13)
}
  0x79   : > { %s4057_s10 = scalar_lea.vmem %s268_s18, 128  ;;  %s4157_s14 = smov [#allocation7]  }
  0x7a   : > { %p4058_p6 = scmp.ne.s32.totalorder %s268_s18, %s4057_s10  ;;  %s4062_s16 = sshll.u32 %s4157_s14, 4  ;;  %s4063_s16 = int_to_ptr.vmem [resolvable:$false] %s4062_s16 }
  0x7b   : > { %s4064_s30 = scalar_lea.vmem %s4063_s16, 256  ;;  %p4065_p5 = scmp.lt.s32.totalorder %s268_s18, %s4063_s16 }
  0x7c   : > { %p4060_p10 = pnand %p4058_p6, %p4014_p0  ;;  %p4066_p8 = scmp.lt.s32.totalorder %s4064_s30, %s4057_s10 }
  0x7e   : > { %p4061_p4 = pneg %p4060_p10  ;;  %p4067_p3 = por %p4066_p8, %p4065_p5 }
  0x80   : > { %p4068_p7 = pnand %p4067_p3, %p4061_p4 }
  0x82   : > { %4071 = shalt.err (!%p4068_p7)
}
  0x83   : > { %3844 = dma.hbm_to_vmem [thread:$0]  (!%p4367_p11), %s4374_s8, 128, %s268_s18, %s257_s13  }
  0x84   : > { %p4822_p1 = scmp.ne.s32.totalorder %s4814_s29, 0 }
  0x85   : > { %s4427_s20 = sand.u32 (!%p4822_p1), 1, %s4142_s22   ;;  %p4823_p8 = scmp.ne.s32.totalorder (!%p4822_p1), %s4812_s27, 0 }
  0x86   : > { %276 = sbr.rel (%p4822_p1) target bundleno = 1721 (0x6b9), region = 44  ;;  %s4430_s4 = sshll.u32 (!%p4822_p1), %s4427_s20, 3 }
  0x87   : > { %s279_s15 = scalar_lea.sflag (!%p4822_p1), [#allocation5], %s4427_s20  ;;  %s282_s17 = scalar_lea.vmem (!%p4822_p1), [#allocation4], %s4430_s4 }
  0x8d   : > { %4117 = dma.done.wait (%p4823_p8), %s279_s15, 128  }
  0x8e   : > { %4119 = vsyncadd (%p4823_p8), %s279_s15, 4294967168  ;;  %s287_s29 = sand.u32 1, %s4248_s25   ;;  %s291_s8 = scalar_lea.vmem [#allocation7], %s4430_s4 }
  0x8f   : > { %s288_s7 = scalar_lea.sflag [#allocation8], %s287_s29 }
  0x90   : > { %4121 = dma.done.wait (%p4823_p8), %s288_s7, 128  }
  0x91   : > { %4123 = vsyncadd (%p4823_p8), %s288_s7, 4294967168  ;;  %p4824_p11 = scmp.eq.s32.totalorder %s4248_s25, 0 }
  0x93   : > { %4125 = dma.done.wait (%p4824_p11), [#allocation8], 1024   ;;  %p4825_p0 = pmov %p4824_p11 }
  0x95   : > { %4127 = vsyncadd (%p4825_p0), [#allocation8], 4294966272  ;;  %p4826_p9 = pmov %p4825_p0 }
  0x96   : > { %p4827_p12 = pmov %p4825_p0 }
  0x97   : > { %4129 = dma.done.wait (%p4826_p9), [#allocation11], 1024  }
  0x98   : > { %4131 = vsyncadd (%p4827_p12), [#allocation11], 4294966272  ;;  %v4158_v0 = vmov 0.0|0.0   ;;  %vm4159_vm0 = vmmov 0   ;;  %v4160_v1 = vmov 0.0   ;;  %v421_v2 = vld [vmem:[#allocation9 + $0x20] sm:$0xff] }
  0x99   : > { %3783 = vmatprep.subr.bf16.mxu1 %v4158_v0  ;;  %3777 = vmatprep.subr.bf16.mxu0 %v4158_v0  ;;  %v422_v3 = vld [vmem:[#allocation9 + $0x28] sm:$0xff]  ;;  %v335_v4 = vld [vmem:[#allocation9] sm:$0xff]  ;;  %v423_v7 = vld [vmem:[#allocation9 + $0x30] sm:$0xff]  ;;  %vm346_vm1 = vcmask 261120   ;;  %s4161_s2 = smov 92   ;;  %s4162_s19 = smov 96  }
  0x9a   : > { %3592 = vmatprep.mubr.msk.f32.mxu1 %vm4159_vm0, %v4160_v1  ;;  %3581 = vmatprep.mubr.msk.f32.mxu0 %vm4159_vm0, %v4160_v1  ;;  %v3784_v5 = vpack.c.bf16 %v422_v3, %v421_v2  ;;  %v336_v6 = vld [vmem:[#allocation9 + $0x8] sm:$0xff]  ;;  %v424_v8 = vld [vmem:[#allocation9 + $0x38] sm:$0xff]  ;;  %v337_v10 = vld [vmem:[#allocation9 + $0x10] sm:$0xff]  ;;  %s4163_s11 = smov 124   ;;  %s4164_s10 = smov 120   ;;  %vm509_vm2 = vcmask 31744  }
  0x9b   : > { %v3778_v9 = vpack.c.bf16 %v336_v6, %v335_v4  ;;  %v338_v11 = vld [vmem:[#allocation9 + $0x18] sm:$0xff]  ;;  %v3787_v12 = vpack.c.bf16 %v424_v8, %v423_v7  ;;  %v333_v15 = vld [vmem:[%s282_s17] sm:$0xff]  ;;  %v3432_v16 = vld [vmem:[%s4802_s3 + $0x1] ss:$0 sm:$0xff]  ;;  %s4165_s14 = smov 88   ;;  %s4166_s16 = smov 116  }
  0x9c   : > { %3785 = vmatpush3.bf16.msra.mxu1 %v3784_v5  ;;  %v3781_v13 = vpack.c.bf16 %v338_v11, %v337_v10  ;;  %v334_v14 = vld [vmem:[%s291_s8] sm:$0xff]  ;;  %s4167_s30 = smov 84   ;;  %s4168_s15 = smov 112   ;;  %vm662_vm3 = vcmask 64512   ;;  %vm1146_vm4 = vcmask 64544   ;;  %vm1474_vm5 = vcmask 97344  }
  0x9d   : > { %3786 = vmatprep.subr.bf16.mxu1 %v4158_v0  ;;  %3779 = vmatpush3.bf16.msra.mxu0 %v3778_v9  ;;  %v3429_v18 = vld [vmem:[%s4802_s3] ss:$0 sm:$0xff]  ;;  %s4169_s17 = smov 80   ;;  %s4170_s29 = smov 108   ;;  %vm1802_vm6 = vcmask 130144   ;;  %vm2130_vm7 = vcmask 162944  }
  0x9e   : > { %3780 = vmatprep.subr.bf16.mxu0 %v4158_v0  ;;  %s4171_s7 = smov 76   ;;  %s4172_s8 = smov 104   ;;  %vm2458_vm8 = vcmask 195744   ;;  %vm2786_vm9 = vcmask 228544   ;;  %vm3114_vm10 = vcmask 261344   ;;  %vm3286_vm11 = vcmask 523264  }
  0x9f   : > { %s4173_s27 = smov 72   ;;  %s4174_s18 = smov 100  }
  0xa0   : > { %3788 = vmatpush3.bf16.msra.mxu1 %v3787_v12  ;;  %s4175_s13 = smov 68   ;;  %s4176_s12 = smov 64  }
  0xa1   : > { %3782 = vmatpush3.bf16.msra.mxu0 %v3781_v13  ;;  %3605 = vmatprep.subr.mxu1 %v4160_v1  ;;  %p4828_p13 = scmp.ne.s32.totalorder %s4819_s9, 0 }
  0xa2   : > { %3595 = vmatprep.subr.mxu0 %v4160_v1 }
  0xa3   : > { %3593 = vmatmul.mubr.msk.f32.vlgmr.msra.gmra.mrb[0].mxu1 %vm346_vm1, %v334_v14 }
  0xa4   : > { %3582 = vmatmul.mubr.msk.f32.vlgmr.msra.gmra.mrb[0].mxu0 %vm346_vm1, %v333_v15  ;;  %3607 = vmatprep.mubr.msk.f32.mxu1 %vm4159_vm0, %v4160_v1 }
  0xa5   : > { %3597 = vmatprep.mubr.msk.f32.mxu0 %vm4159_vm0, %v4160_v1 }
 0x176   : > { %v502_v17 = vpop.f32.mrb[0].mxu1 }
 0x177   : > { %v4478_v19 = vadd.f32 %v3432_v16, %v502_v17  ;;  %v3594_v20 = vpop.f32.mrb[1].mxu1  ;;  %v416_v21 = vpop.f32.mrb[0].mxu0 }
 0x178   : > { %v3583_v22 = vpop.f32.mrb[1].mxu0  ;;  %v4482_v23 = vadd.f32 %v3429_v18, %v416_v21 }
 0x179   : > { %827 = vrot.lane.b32.xlu1 %v4478_v19, %s4161_s2  ;;  %507 = vrot.lane.b32.xlu0 %v4478_v19, %s4162_s19 }
 0x17d   : > { %825 = vrot.lane.b32.xlu1 %v4478_v19, %s4163_s11  ;;  %585 = vrot.lane.b32.xlu0 %v4482_v23, %s4162_s19  ;;  %s4178_s19 = smov 56  }
 0x181   : > { %903 = vrot.lane.b32.xlu1 %v4482_v23, %s4163_s11  ;;  %905 = vrot.lane.b32.xlu0 %v4482_v23, %s4161_s2  ;;  %s4177_s2 = smov 60   ;;  %s4179_s11 = smov 52  }
 0x185   : > { %1153 = vrot.lane.b32.xlu1 %v4478_v19, %s4164_s10  ;;  %1155 = vrot.lane.b32.xlu0 %v4478_v19, %s4165_s14 }
 0x189   : > { %1231 = vrot.lane.b32.xlu1 %v4482_v23, %s4164_s10  ;;  %1233 = vrot.lane.b32.xlu0 %v4482_v23, %s4165_s14  ;;  %s4180_s10 = smov 48   ;;  %s4181_s14 = smov 44  }
 0x18d   : > { %1481 = vrot.lane.b32.xlu1 %v4478_v19, %s4166_s16  ;;  %1483 = vrot.lane.b32.xlu0 %v4478_v19, %s4167_s30 }
 0x191   : > { %1559 = vrot.lane.b32.xlu1 %v4482_v23, %s4166_s16  ;;  %1561 = vrot.lane.b32.xlu0 %v4482_v23, %s4167_s30  ;;  %s4182_s16 = smov 40   ;;  %s4183_s30 = smov 36  }
 0x195   : > { %1809 = vrot.lane.b32.xlu1 %v4478_v19, %s4168_s15  ;;  %1811 = vrot.lane.b32.xlu0 %v4478_v19, %s4169_s17 }
 0x199   : > { %1887 = vrot.lane.b32.xlu1 %v4482_v23, %s4168_s15  ;;  %1889 = vrot.lane.b32.xlu0 %v4482_v23, %s4169_s17  ;;  %s4184_s15 = smov 4   ;;  %s4185_s17 = smov 8  }
 0x19d   : > { %2137 = vrot.lane.b32.xlu1 %v4478_v19, %s4170_s29  ;;  %2139 = vrot.lane.b32.xlu0 %v4478_v19, %s4171_s7 }
 0x1a1   : > { %2215 = vrot.lane.b32.xlu1 %v4482_v23, %s4170_s29  ;;  %2217 = vrot.lane.b32.xlu0 %v4482_v23, %s4171_s7  ;;  %s4186_s29 = smov 12   ;;  %s4187_s7 = smov 16  }
 0x1a5   : > { %2465 = vrot.lane.b32.xlu1 %v4478_v19, %s4172_s8  ;;  %2467 = vrot.lane.b32.xlu0 %v4478_v19, %s4173_s27 }
 0x1a9   : > { %2543 = vrot.lane.b32.xlu1 %v4482_v23, %s4172_s8  ;;  %2545 = vrot.lane.b32.xlu0 %v4482_v23, %s4173_s27  ;;  %s4188_s8 = smov 20   ;;  %s4189_s27 = smov 24  }
 0x1ad   : > { %2793 = vrot.lane.b32.xlu1 %v4478_v19, %s4174_s18  ;;  %2795 = vrot.lane.b32.xlu0 %v4478_v19, %s4175_s13 }
 0x1b1   : > { %2871 = vrot.lane.b32.xlu1 %v4482_v23, %s4174_s18  ;;  %2873 = vrot.lane.b32.xlu0 %v4482_v23, %s4175_s13  ;;  %s4190_s18 = smov 28  }
 0x1b5   : > { %674 = vrot.lane.b32.xlu1 %v4482_v23, %s4176_s12  ;;  %750 = vrot.lane.b32.xlu0 %v4478_v19, %s4176_s12 }
 0x1b9   : > { %993 = vrot.lane.b32.xlu0 %v4482_v23, %s4177_s2 }
 0x1bd   : > { %1069 = vrot.lane.b32.xlu0 %v4478_v19, %s4177_s2  ;;  %s3486_s2 = sshll.u32 %s4248_s25, 7  ;;  %s4191_s25 = smov [#allocation12]  }
 0x1eb   : > { %v828_v24 = vpop.permute.xlu1 %827  ;;  %v508_v25 = vpop.permute.xlu0 %507 }
 0x1ec   : > { %3596 = vmatpush3.xpose.msk.msra.mxu0 %vm509_vm2, %v508_v25 }
 0x1ed   : > { %3600 = vmatprep.subr.mxu0 %v4160_v1 }
 0x1ef   : > { %v826_v26 = vpop.permute.xlu1 %825  ;;  %3598 = vmatmul.mubr.msk.f32.vlgmr.msra.gmra.mrb[2].mxu0 %vm509_vm2, %v4478_v19  ;;  %v586_v27 = vpop.permute.xlu0 %585 }
 0x1f0   : > { %3601 = vmatpush3.xpose.msk.msra.mxu0 %vm509_vm2, %v586_v27  ;;  %3602 = vmatprep.mubr.msk.f32.mxu0 %vm4159_vm0, %v4160_v1 }
 0x1f1   : > { %3615 = vmatprep.subr.mxu0 %v4160_v1 }
 0x1f3   : > { %v904_v28 = vpop.permute.xlu1 %903  ;;  %v906_v30 = vpop.permute.xlu0 %905 }
 0x1f7   : > { %v1154_v29 = vpop.permute.xlu1 %1153  ;;  %3603 = vmatmul.mubr.msk.f32.vlgmr.msra.gmra.mrb[2].mxu0 %vm509_vm2, %v4482_v23  ;;  %v1156_v33 = vpop.permute.xlu0 %1155 }
 0x1f8   : > { %3616 = vmatpush3.xpose.msk.msra.mxu0 %vm509_vm2, %v828_v24  ;;  %3617 = vmatprep.mubr.msk.f32.mxu0 %vm4159_vm0, %v4160_v1 }
 0x1f9   : > { %3620 = vmatprep.subr.mxu0 %v4160_v1 }
 0x1fb   : > { %v1232_v31 = vpop.permute.xlu1 %1231  ;;  %3618 = vmatmul.mubr.msk.f32.vlgmr.msra.gmra.mrb[4].mxu0 %vm509_vm2, %v826_v26  ;;  %v1234_v35 = vpop.permute.xlu0 %1233 }
 0x1fc   : > { %3621 = vmatpush3.xpose.msk.msra.mxu0 %vm509_vm2, %v906_v30  ;;  %3622 = vmatprep.mubr.msk.f32.mxu0 %vm4159_vm0, %v4160_v1 }
 0x1fd   : > { %3635 = vmatprep.subr.mxu0 %v4160_v1 }
 0x1ff   : > { %v1482_v32 = vpop.permute.xlu1 %1481  ;;  %v1484_v38 = vpop.permute.xlu0 %1483 }
 0x203   : > { %v1560_v34 = vpop.permute.xlu1 %1559  ;;  %3623 = vmatmul.mubr.msk.f32.vlgmr.msra.gmra.mrb[4].mxu0 %vm509_vm2, %v904_v28  ;;  %v1562_v40 = vpop.permute.xlu0 %1561 }
 0x204   : > { %3636 = vmatpush3.xpose.msk.msra.mxu0 %vm509_vm2, %v1156_v33  ;;  %3637 = vmatprep.mubr.msk.f32.mxu0 %vm4159_vm0, %v4160_v1 }
 0x205   : > { %3640 = vmatprep.subr.mxu0 %v4160_v1 }
 0x207   : > { %v1810_v36 = vpop.permute.xlu1 %1809  ;;  %3638 = vmatmul.mubr.msk.f32.vlgmr.msra.gmra.mrb[6].mxu0 %vm509_vm2, %v1154_v29  ;;  %v1812_v43 = vpop.permute.xlu0 %1811 }
 0x208   : > { %3641 = vmatpush3.xpose.msk.msra.mxu0 %vm509_vm2, %v1234_v35  ;;  %3642 = vmatprep.mubr.msk.f32.mxu0 %vm4159_vm0, %v4160_v1 }
 0x209   : > { %3655 = vmatprep.subr.mxu0 %v4160_v1 }
 0x20b   : > { %v1888_v37 = vpop.permute.xlu1 %1887  ;;  %v1890_v45 = vpop.permute.xlu0 %1889 }
 0x20f   : > { %v2138_v39 = vpop.permute.xlu1 %2137  ;;  %3643 = vmatmul.mubr.msk.f32.vlgmr.msra.gmra.mrb[6].mxu0 %vm509_vm2, %v1232_v31  ;;  %v2140_v48 = vpop.permute.xlu0 %2139 }
 0x210   : > { %3656 = vmatpush3.xpose.msk.msra.mxu0 %vm509_vm2, %v1484_v38  ;;  %3657 = vmatprep.mubr.msk.f32.mxu0 %vm4159_vm0, %v4160_v1 }
 0x211   : > { %3660 = vmatprep.subr.mxu0 %v4160_v1 }
 0x213   : > { %v2216_v41 = vpop.permute.xlu1 %2215  ;;  %3658 = vmatmul.mubr.msk.f32.vlgmr.msra.gmra.mrb[8].mxu0 %vm509_vm2, %v1482_v32  ;;  %v2218_v50 = vpop.permute.xlu0 %2217 }
 0x214   : > { %3661 = vmatpush3.xpose.msk.msra.mxu0 %vm509_vm2, %v1562_v40  ;;  %3662 = vmatprep.mubr.msk.f32.mxu0 %vm4159_vm0, %v4160_v1 }
 0x215   : > { %3675 = vmatprep.subr.mxu0 %v4160_v1 }
 0x217   : > { %v2466_v42 = vpop.permute.xlu1 %2465  ;;  %v2468_v51 = vpop.permute.xlu0 %2467 }
 0x21b   : > { %v2544_v44 = vpop.permute.xlu1 %2543  ;;  %3663 = vmatmul.mubr.msk.f32.vlgmr.msra.gmra.mrb[8].mxu0 %vm509_vm2, %v1560_v34  ;;  %v2546_v52 = vpop.permute.xlu0 %2545 }
 0x21c   : > { %3676 = vmatpush3.xpose.msk.msra.mxu0 %vm509_vm2, %v1812_v43  ;;  %3677 = vmatprep.mubr.msk.f32.mxu0 %vm4159_vm0, %v4160_v1 }
 0x21d   : > { %3680 = vmatprep.subr.mxu0 %v4160_v1 }
 0x21f   : > { %v2794_v46 = vpop.permute.xlu1 %2793  ;;  %3678 = vmatmul.mubr.msk.f32.vlgmr.msra.gmra.mrb[10].mxu0 %vm509_vm2, %v1810_v36  ;;  %v2796_v53 = vpop.permute.xlu0 %2795 }
 0x220   : > { %3681 = vmatpush3.xpose.msk.msra.mxu0 %vm509_vm2, %v1890_v45  ;;  %3682 = vmatprep.mubr.msk.f32.mxu0 %vm4159_vm0, %v4160_v1 }
 0x221   : > { %3695 = vmatprep.subr.mxu0 %v4160_v1 }
 0x223   : > { %v2872_v47 = vpop.permute.xlu1 %2871  ;;  %v2874_v54 = vpop.permute.xlu0 %2873 }
 0x227   : > { %v675_v49 = vpop.permute.xlu1 %674  ;;  %3683 = vmatmul.mubr.msk.f32.vlgmr.msra.gmra.mrb[10].mxu0 %vm509_vm2, %v1888_v37  ;;  %v4615_v27 = vpop.permute.xlu0 %750 }
 0x228   : > { %3696 = vmatpush3.xpose.msk.msra.mxu0 %vm509_vm2, %v2140_v48  ;;  %3606 = vmatpush3.msra.mxu1 %v675_v49 }
 0x229   : > { %3697 = vmatprep.mubr.msk.f32.mxu0 %vm4159_vm0, %v4160_v1  ;;  %3700 = vmatprep.subr.mxu0 %v4160_v1 }
 0x22a   : > { %3610 = vmatprep.subr.mxu1 %v4160_v1 }
 0x22b   : > { %3698 = vmatmul.mubr.msk.f32.vlgmr.msra.gmra.mrb[12].mxu0 %vm509_vm2, %v2138_v39  ;;  %v4617_v28 = vpop.permute.xlu0 %993 }
 0x22c   : > { %3701 = vmatpush3.xpose.msk.msra.mxu0 %vm509_vm2, %v2218_v50  ;;  %3702 = vmatprep.mubr.msk.f32.mxu0 %vm4159_vm0, %v4160_v1 }
 0x22d   : > { %3715 = vmatprep.subr.mxu0 %v4160_v1 }
 0x22f   : > { %v4621_v29 = vpop.permute.xlu0 %1069 }
 0x233   : > { %3703 = vmatmul.mubr.msk.f32.vlgmr.msra.gmra.mrb[12].mxu0 %vm509_vm2, %v2216_v41 }
 0x234   : > { %3716 = vmatpush3.xpose.msk.msra.mxu0 %vm509_vm2, %v2468_v51  ;;  %3717 = vmatprep.mubr.msk.f32.mxu0 %vm4159_vm0, %v4160_v1 }
 0x235   : > { %3720 = vmatprep.subr.mxu0 %v4160_v1 }
 0x237   : > { %3718 = vmatmul.mubr.msk.f32.vlgmr.msra.gmra.mrb[14].mxu0 %vm509_vm2, %v2466_v42 }
 0x238   : > { %3721 = vmatpush3.xpose.msk.msra.mxu0 %vm509_vm2, %v2546_v52  ;;  %3722 = vmatprep.mubr.msk.f32.mxu0 %vm4159_vm0, %v4160_v1 }
 0x239   : > { %3735 = vmatprep.subr.mxu0 %v4160_v1 }
 0x23f   : > { %3723 = vmatmul.mubr.msk.f32.vlgmr.msra.gmra.mrb[14].mxu0 %vm509_vm2, %v2544_v44 }
 0x240   : > { %3736 = vmatpush3.xpose.msk.msra.mxu0 %vm509_vm2, %v2796_v53  ;;  %3737 = vmatprep.mubr.msk.f32.mxu0 %vm4159_vm0, %v4160_v1 }
 0x241   : > { %3740 = vmatprep.subr.mxu0 %v4160_v1 }
 0x243   : > { %3738 = vmatmul.mubr.msk.f32.vlgmr.msra.gmra.mrb[16].mxu0 %vm509_vm2, %v2794_v46 }
 0x244   : > { %3741 = vmatpush3.xpose.msk.msra.mxu0 %vm509_vm2, %v2874_v54  ;;  %3742 = vmatprep.mubr.msk.f32.mxu0 %vm4159_vm0, %v4160_v1 }
 0x245   : > { %3789 = vmatprep.subr.bf16.mxu0 %v4158_v0 }
 0x24b   : > { %3743 = vmatmul.mubr.msk.f32.vlgmr.msra.gmra.mrb[16].mxu0 %vm509_vm2, %v2872_v47 }
 0x24c   : > { %3763 = vmatprep.mubr.msk.f32.mxu0 %vm4159_vm0, %v4160_v1 }
 0x2ca   : > { %v657_v55 = vpop.f32.mrb[2].mxu0 }
 0x2cb   : > { %v661_v56 = vmul.f32 0.5, %v657_v55  ;;  %v3604_v57 = vpop.f32.mrb[3].mxu0 }
 0x2cd   : > { %v663_v58 = vsel %vm662_vm3, %v661_v56, -inf }
 0x2ce   : > { %664 = vmax.xlane.f32.xlu0 %v663_v58 }
 0x2d6   : > { %v977_v59 = vpop.f32.mrb[4].mxu0 }
 0x2d7   : > { %v981_v60 = vmul.f32 0.5, %v977_v59  ;;  %v3624_v61 = vpop.f32.mrb[5].mxu0 }
 0x2d9   : > { %v982_v62 = vsel %vm662_vm3, %v981_v60, -inf }
 0x2da   : > { %983 = vmax.xlane.f32.xlu1 %v982_v62 }
 0x2e2   : > { %v1305_v63 = vpop.f32.mrb[6].mxu0 }
 0x2e3   : > { %v1309_v2 = vmul.f32 0.5, %v1305_v63  ;;  %v3644_v3 = vpop.f32.mrb[7].mxu0 }
 0x2e5   : > { %v1310_v4 = vsel %vm662_vm3, %v1309_v2, -inf }
 0x2e6   : > { %1311 = vmax.xlane.f32.xlu0 %v1310_v4 }
 0x2ee   : > { %v1633_v5 = vpop.f32.mrb[8].mxu0 }
 0x2ef   : > { %v1637_v6 = vmul.f32 0.5, %v1633_v5  ;;  %v3664_v7 = vpop.f32.mrb[9].mxu0 }
 0x2f1   : > { %v1638_v8 = vsel %vm662_vm3, %v1637_v6, -inf }
 0x2f2   : > { %1639 = vmax.xlane.f32.xlu0 %v1638_v8 }
 0x2fa   : > { %v1961_v9 = vpop.f32.mrb[10].mxu0 }
 0x2fb   : > { %v1965_v10 = vmul.f32 0.5, %v1961_v9  ;;  %v3684_v11 = vpop.f32.mrb[11].mxu0 }
 0x2fd   : > { %v1966_v12 = vsel %vm662_vm3, %v1965_v10, -inf }
 0x2fe   : > { %1967 = vmax.xlane.f32.xlu1 %v1966_v12 }
 0x306   : > { %v2289_v13 = vpop.f32.mrb[12].mxu0 }
 0x307   : > { %v4604_v14 = vmul.f32 0.5, %v2289_v13  ;;  %v3704_v15 = vpop.f32.mrb[13].mxu0 }
 0x309   : > { %v2294_v16 = vsel %vm662_vm3, %v4604_v14, -inf }
 0x30a   : > { %2295 = vmax.xlane.f32.xlu0 %v2294_v16 }
 0x312   : > { %v2617_v17 = vpop.f32.mrb[14].mxu0 }
 0x313   : > { %v2621_v18 = vmul.f32 0.5, %v2617_v17  ;;  %v3724_v20 = vpop.f32.mrb[15].mxu0 }
 0x315   : > { %v2622_v21 = vsel %vm662_vm3, %v2621_v18, -inf }
 0x316   : > { %2623 = vmax.xlane.f32.xlu1 %v2622_v21 }
 0x31e   : > { %v2945_v22 = vpop.f32.mrb[16].mxu0 }
 0x31f   : > { %v3744_v24 = vpop.f32.mrb[17].mxu0  ;;  %v4611_v25 = vmul.f32 0.5, %v2945_v22 }
 0x320   : > { %1397 = vrot.lane.b32.xlu0 %v4478_v19, %s4178_s19 }
 0x321   : > { %v2950_v26 = vsel %vm662_vm3, %v4611_v25, -inf }
 0x327   : > { %1321 = vrot.lane.b32.xlu1 %v4482_v23, %s4178_s19  ;;  %s332_s19 = scalar_lea.vmem [#allocation12], %s4430_s4  ;;  %s4076_s4 = sshll.u32 %s4191_s25, 4  ;;  %s4077_s4 = int_to_ptr.vmem [resolvable:$false] %s4076_s4 }
 0x33f   : > { %2951 = vmax.xlane.f32.xlu0 %v2950_v26 }
 0x355   : > { %1649 = vrot.lane.b32.xlu0 %v4482_v23, %s4179_s11 }
 0x35b   : > { %v665_v30 = vpop.xlane.xlu0 %664 }
 0x35c   : > { %v666_v31 = vsub.f32 %v661_v56, %v665_v30 }
 0x35e   : > { %v667_v32 = vmul.f32 1.442695, %v666_v31 }
 0x360   : > { %3924 = vpow2.f32 %v667_v32 }
 0x367   : > { %v984_v33 = vpop.xlane.xlu1 %983 }
 0x368   : > { %v985_v34 = vsub.f32 %v981_v60, %v984_v33 }
 0x36a   : > { %v4623_v35 = vpop.eup %3924  ;;  %v986_v36 = vmul.f32 1.442695, %v985_v34 }
 0x36b   : > { %v669_v37 = vsel %vm662_vm3, %v4623_v35, 0.0 }
 0x36c   : > { %3926 = vpow2.f32 %v986_v36  ;;  %670 = vadd.xlane.f32.xlu1 %v669_v37 }
 0x373   : > { %v1312_v38 = vpop.xlane.xlu0 %1311 }
 0x374   : > { %v1313_v39 = vsub.f32 %v1309_v2, %v1312_v38 }
 0x376   : > { %v4627_v40 = vpop.eup %3926  ;;  %v1314_v41 = vmul.f32 1.442695, %v1313_v39 }
 0x377   : > { %v988_v42 = vsel %vm662_vm3, %v4627_v40, 0.0 }
 0x378   : > { %3928 = vpow2.f32 %v1314_v41  ;;  %989 = vadd.xlane.f32.xlu0 %v988_v42 }
 0x37f   : > { %v1640_v43 = vpop.xlane.xlu0 %1639 }
 0x380   : > { %v1641_v44 = vsub.f32 %v1637_v6, %v1640_v43 }
 0x382   : > { %v4631_v45 = vpop.eup %3928  ;;  %v1642_v46 = vmul.f32 1.442695, %v1641_v44 }
 0x383   : > { %v1316_v47 = vsel %vm662_vm3, %v4631_v45, 0.0 }
 0x384   : > { %3930 = vpow2.f32 %v1642_v46  ;;  %1317 = vadd.xlane.f32.xlu1 %v1316_v47 }
 0x38b   : > { %v1968_v50 = vpop.xlane.xlu1 %1967 }
 0x38c   : > { %v1969_v51 = vsub.f32 %v1965_v10, %v1968_v50 }
 0x38e   : > { %v4635_v48 = vpop.eup %3930  ;;  %v1970_v53 = vmul.f32 1.442695, %v1969_v51 }
 0x38f   : > { %v1644_v49 = vsel %vm662_vm3, %v4635_v48, 0.0 }
 0x390   : > { %1645 = vadd.xlane.f32.xlu0 %v1644_v49  ;;  %3932 = vpow2.f32 %v1970_v53 }
 0x395   : > { %1977 = vrot.lane.b32.xlu1 %v4482_v23, %s4180_s10 }
 0x397   : > { %v2296_v55 = vpop.xlane.xlu0 %2295 }
 0x398   : > { %v2297_v56 = vsub.f32 %v4604_v14, %v2296_v55 }
 0x399   : > { %2053 = vrot.lane.b32.xlu1 %v4478_v19, %s4180_s10 }
 0x39a   : > { %v2298_v58 = vmul.f32 1.442695, %v2297_v56  ;;  %v4644_v59 = vpop.eup %3932 }
 0x39b   : > { %v1972_v60 = vsel %vm662_vm3, %v4644_v59, 0.0  ;;  %v1398_v3 = vpop.permute.xlu0 %1397 }
 0x3a3   : > { %v2624_v52 = vpop.xlane.xlu1 %2623 }
 0x3a4   : > { %v2625_v54 = vsub.f32 %v2621_v18, %v2624_v52 }
 0x3a6   : > { %1725 = vrot.lane.b32.xlu0 %v4478_v19, %s4179_s11  ;;  %v2626_v57 = vmul.f32 1.442695, %v2625_v54  ;;  %s3302_s11 = sshll.u32 %s332_s19, 4  ;;  %s4757_s11 = int_to_ptr.vmem [resolvable:$true] %s3302_s11 }
 0x3a7   : > { %v1322_v9 = vpop.permute.xlu1 %1321  ;;  %p4079_p4 = scmp.lt.s32.totalorder %s4757_s11, %s4077_s4 }
 0x3a8   : > { %3934 = vpow2.f32 %v2626_v57 }
 0x3a9   : > { %3936 = vpow2.f32 %v2298_v58 }
 0x3b2   : > { %v4648_v61 = vpop.eup %3934 }
 0x3b3   : > { %v2628_v62 = vsel %vm662_vm3, %v4648_v61, 0.0  ;;  %v4652_v63 = vpop.eup %3936 }
 0x3b4   : > { %v2300_v2 = vsel %vm662_vm3, %v4652_v63, 0.0 }
 0x3bd   : > { %1973 = vadd.xlane.f32.xlu1 %v1972_v60 }
 0x3c1   : > { %2629 = vadd.xlane.f32.xlu1 %v2628_v62 }
 0x3c5   : > { %2301 = vadd.xlane.f32.xlu0 %v2300_v2 }
 0x3cc   : > { %v2952_v4 = vpop.xlane.xlu0 %2951 }
 0x3cd   : > { %v2953_v5 = vsub.f32 %v4611_v25, %v2952_v4  ;;  %v3123_v4 = vld [vmem:[#allocation10 + $0x8] sm:$0xff] }
 0x3cf   : > { %v2954_v6 = vmul.f32 1.442695, %v2953_v5 }
 0x3d0   : > { %v1650_v11 = vpop.permute.xlu0 %1649 }
 0x3d1   : > { %3938 = vpow2.f32 %v2954_v6 }
 0x3d2   : > { %2381 = vrot.lane.b32.xlu1 %v4478_v19, %s4181_s14 }
 0x3d6   : > { %2633 = vrot.lane.b32.xlu1 %v4482_v23, %s4182_s16 }
 0x3da   : > { %2709 = vrot.lane.b32.xlu1 %v4478_v19, %s4182_s16  ;;  %s4755_s16 = scalar_lea.hbm %s4805_s6, %s3486_s2 }
 0x3db   : > { %v4660_v7 = vpop.eup %3938 }
 0x3dc   : > { %v2956_v8 = vsel %vm662_vm3, %v4660_v7, 0.0 }
 0x3dd   : > { %2957 = vadd.xlane.f32.xlu0 %v2956_v8  ;;  %v3128_v8 = vld [vmem:[#allocation10 + $0x20] sm:$0xff] }
 0x3de   : > { %2961 = vrot.lane.b32.xlu1 %v4482_v23, %s4183_s30 }
 0x3e2   : > { %3037 = vrot.lane.b32.xlu1 %v4478_v19, %s4183_s30  ;;  %s3289_s30 = scalar_lea.sflag [#allocation6], %s4427_s20 }
 0x3f3   : > { %2305 = vrot.lane.b32.xlu0 %v4482_v23, %s4181_s14 }
 0x3f9   : > { %v671_v10 = vpop.xlane.xlu1 %670 }
 0x3fa   : > { %3940 = vrcp.f32 %v671_v10  ;;  %v3124_v10 = vld [vmem:[#allocation10 + $0x10] sm:$0xff] }
 0x404   : > { %v3941_v12 = vpop.eup %3940 }
 0x405   : > { %v673_v13 = vmul.f32 %v3941_v12, %v4623_v35  ;;  %v990_v14 = vpop.xlane.xlu0 %989 }
 0x406   : > { %3942 = vrcp.f32 %v990_v14 }
 0x407   : > { %3608 = vmatmul.mubr.msk.f32.vlgmr.msra.gmra.mrb[2].mxu1 %vm662_vm3, %v673_v13 }
 0x408   : > { %3611 = vmatpush3.msra.mxu1 %v4615_v27  ;;  %3612 = vmatprep.mubr.msk.f32.mxu1 %vm4159_vm0, %v4160_v1 }
 0x409   : > { %3625 = vmatprep.subr.mxu1 %v4160_v1 }
 0x40b   : > { %3613 = vmatmul.mubr.msk.f32.vlgmr.msra.gmra.mrb[4].mxu1 %vm662_vm3, %v673_v13  ;;  %v3125_v13 = vld [vmem:[#allocation10 + $0x18] sm:$0xff] }
 0x40c   : > { %3626 = vmatpush3.msra.mxu1 %v4617_v28  ;;  %3627 = vmatprep.mubr.msk.f32.mxu1 %vm4159_vm0, %v4160_v1 }
 0x40d   : > { %3630 = vmatprep.subr.mxu1 %v4160_v1 }
 0x410   : > { %v3943_v19 = vpop.eup %3942 }
 0x411   : > { %v992_v23 = vmul.f32 %v3943_v19, %v4627_v40  ;;  %v1318_v15 = vpop.xlane.xlu1 %1317  ;;  %v3799_v19 = vpack.c.bf16 %v3125_v13, %v3124_v10 }
 0x412   : > { %3944 = vrcp.f32 %v1318_v15  ;;  %v3131_v15 = vld [vmem:[#allocation10 + $0x38] sm:$0xff] }
 0x413   : > { %3628 = vmatmul.mubr.msk.f32.vlgmr.msra.gmra.mrb[6].mxu1 %vm662_vm3, %v992_v23 }
 0x414   : > { %3631 = vmatpush3.msra.mxu1 %v4621_v29  ;;  %3632 = vmatprep.mubr.msk.f32.mxu1 %vm4159_vm0, %v4160_v1 }
 0x415   : > { %3645 = vmatprep.subr.mxu1 %v4160_v1  ;;  %v1978_v24 = vpop.permute.xlu1 %1977 }
 0x417   : > { %3633 = vmatmul.mubr.msk.f32.vlgmr.msra.gmra.mrb[8].mxu1 %vm662_vm3, %v992_v23  ;;  %v3130_v23 = vld [vmem:[#allocation10 + $0x30] sm:$0xff] }
 0x418   : > { %3646 = vmatpush3.msra.mxu1 %v1322_v9  ;;  %3647 = vmatprep.mubr.msk.f32.mxu1 %vm4159_vm0, %v4160_v1  ;;  %v3129_v9 = vld [vmem:[#allocation10 + $0x28] sm:$0xff] }
 0x419   : > { %3650 = vmatprep.subr.mxu1 %v4160_v1  ;;  %v2054_v25 = vpop.permute.xlu1 %2053  ;;  %v3790_v12 = vpack.c.bf16 %v3129_v9, %v3128_v8 }
 0x41b   : > { %3791 = vmatpush3.bf16.msra.mxu0 %v3790_v12 }
 0x41c   : > { %v3945_v16 = vpop.eup %3944  ;;  %3792 = vmatprep.subr.bf16.mxu0 %v4158_v0 }
 0x41d   : > { %v1320_v17 = vmul.f32 %v3945_v16, %v4631_v45  ;;  %v1646_v18 = vpop.xlane.xlu0 %1645 }
 0x41e   : > { %3946 = vrcp.f32 %v1646_v18 }
 0x41f   : > { %3648 = vmatmul.mubr.msk.f32.vlgmr.msra.gmra.mrb[10].mxu1 %vm662_vm3, %v1320_v17 }
 0x420   : > { %3651 = vmatpush3.msra.mxu1 %v1398_v3  ;;  %3652 = vmatprep.mubr.msk.f32.mxu1 %vm4159_vm0, %v4160_v1  ;;  %v3122_v3 = vld [vmem:[#allocation10] sm:$0xff] }
 0x421   : > { %3665 = vmatprep.subr.mxu1 %v4160_v1  ;;  %v1726_v22 = vpop.permute.xlu0 %1725  ;;  %v3796_v6 = vpack.c.bf16 %v3123_v4, %v3122_v3 }
 0x423   : > { %3653 = vmatmul.mubr.msk.f32.vlgmr.msra.gmra.mrb[12].mxu1 %vm662_vm3, %v1320_v17  ;;  %v3793_v17 = vpack.c.bf16 %v3131_v15, %v3130_v23 }
 0x424   : > { %3666 = vmatpush3.msra.mxu1 %v1650_v11  ;;  %3667 = vmatprep.mubr.msk.f32.mxu1 %vm4159_vm0, %v4160_v1 }
 0x425   : > { %3670 = vmatprep.subr.mxu1 %v4160_v1  ;;  %3794 = vmatpush3.bf16.msra.mxu0 %v3793_v17 }
 0x428   : > { %v3947_v20 = vpop.eup %3946 }
 0x429   : > { %v1648_v21 = vmul.f32 %v3947_v20, %v4635_v48 }
 0x42b   : > { %3668 = vmatmul.mubr.msk.f32.vlgmr.msra.gmra.mrb[14].mxu1 %vm662_vm3, %v1648_v21 }
 0x42c   : > { %3671 = vmatpush3.msra.mxu1 %v1726_v22  ;;  %3672 = vmatprep.mubr.msk.f32.mxu1 %vm4159_vm0, %v4160_v1 }
 0x42d   : > { %3685 = vmatprep.subr.mxu1 %v4160_v1 }
 0x42f   : > { %3673 = vmatmul.mubr.msk.f32.vlgmr.msra.gmra.mrb[16].mxu1 %vm662_vm3, %v1648_v21 }
 0x430   : > { %3686 = vmatpush3.msra.mxu1 %v1978_v24  ;;  %3687 = vmatprep.mubr.msk.f32.mxu1 %vm4159_vm0, %v4160_v1 }
 0x431   : > { %3690 = vmatprep.subr.mxu1 %v4160_v1 }
 0x44a   : > { %v1974_v26 = vpop.xlane.xlu1 %1973 }
 0x44b   : > { %3948 = vrcp.f32 %v1974_v26 }
 0x44e   : > { %v2630_v30 = vpop.xlane.xlu1 %2629 }
 0x452   : > { %v2302_v29 = vpop.xlane.xlu0 %2301  ;;  %v2382_v31 = vpop.permute.xlu1 %2381 }
 0x453   : > { %3950 = vrcp.f32 %v2302_v29 }
 0x454   : > { %3952 = vrcp.f32 %v2630_v30 }
 0x455   : > { %v3949_v27 = vpop.eup %3948 }
 0x456   : > { %v1976_v28 = vmul.f32 %v3949_v27, %v4644_v59  ;;  %v2634_v35 = vpop.permute.xlu1 %2633 }
 0x458   : > { %3688 = vmatmul.mubr.msk.f32.vlgmr.msra.gmra.mrb[18].mxu1 %vm662_vm3, %v1976_v28 }
 0x459   : > { %3691 = vmatpush3.msra.mxu1 %v2054_v25  ;;  %3692 = vmatprep.mubr.msk.f32.mxu1 %vm4159_vm0, %v4160_v1 }
 0x45a   : > { %3705 = vmatprep.subr.mxu1 %v4160_v1  ;;  %v2710_v38 = vpop.permute.xlu1 %2709 }
 0x45c   : > { %3693 = vmatmul.mubr.msk.f32.vlgmr.msra.gmra.mrb[20].mxu1 %vm662_vm3, %v1976_v28 }
 0x45d   : > { %3707 = vmatprep.mubr.msk.f32.mxu1 %vm4159_vm0, %v4160_v1  ;;  %v3951_v33 = vpop.eup %3950 }
 0x45e   : > { %v2304_v34 = vmul.f32 %v3951_v33, %v4652_v63  ;;  %v3953_v37 = vpop.eup %3952  ;;  %v2962_v40 = vpop.permute.xlu1 %2961 }
 0x45f   : > { %v2632_v39 = vmul.f32 %v3953_v37, %v4648_v61 }
 0x462   : > { %v3038_v43 = vpop.permute.xlu1 %3037 }
 0x46a   : > { %v2958_v32 = vpop.xlane.xlu0 %2957 }
 0x46b   : > { %3954 = vrcp.f32 %v2958_v32 }
 0x46e   : > { %v2306_v36 = vpop.permute.xlu0 %2305 }
 0x46f   : > { %3706 = vmatpush3.msra.mxu1 %v2306_v36 }
 0x470   : > { %3708 = vmatmul.mubr.msk.f32.vlgmr.msra.gmra.mrb[22].mxu1 %vm662_vm3, %v2304_v34  ;;  %3710 = vmatprep.subr.mxu1 %v4160_v1 }
 0x471   : > { %3711 = vmatpush3.msra.mxu1 %v2382_v31  ;;  %3712 = vmatprep.mubr.msk.f32.mxu1 %vm4159_vm0, %v4160_v1 }
 0x472   : > { %3725 = vmatprep.subr.mxu1 %v4160_v1 }
 0x474   : > { %3713 = vmatmul.mubr.msk.f32.vlgmr.msra.gmra.mrb[24].mxu1 %vm662_vm3, %v2304_v34 }
 0x475   : > { %3726 = vmatpush3.msra.mxu1 %v2634_v35  ;;  %3727 = vmatprep.mubr.msk.f32.mxu1 %vm4159_vm0, %v4160_v1  ;;  %v3955_v41 = vpop.eup %3954 }
 0x476   : > { %3730 = vmatprep.subr.mxu1 %v4160_v1  ;;  %v2960_v42 = vmul.f32 %v3955_v41, %v4660_v7 }
 0x478   : > { %3728 = vmatmul.mubr.msk.f32.vlgmr.msra.gmra.mrb[26].mxu1 %vm662_vm3, %v2632_v39 }
 0x479   : > { %3731 = vmatpush3.msra.mxu1 %v2710_v38  ;;  %3732 = vmatprep.mubr.msk.f32.mxu1 %vm4159_vm0, %v4160_v1 }
 0x47a   : > { %3745 = vmatprep.subr.mxu1 %v4160_v1 }
 0x47c   : > { %3733 = vmatmul.mubr.msk.f32.vlgmr.msra.gmra.mrb[28].mxu1 %vm662_vm3, %v2632_v39 }
 0x47d   : > { %3746 = vmatpush3.msra.mxu1 %v2962_v40  ;;  %3747 = vmatprep.mubr.msk.f32.mxu1 %vm4159_vm0, %v4160_v1 }
 0x47e   : > { %3750 = vmatprep.subr.mxu1 %v4160_v1 }
 0x480   : > { %3748 = vmatmul.mubr.msk.f32.vlgmr.msra.gmra.mrb[30].mxu1 %vm662_vm3, %v2960_v42 }
 0x481   : > { %3751 = vmatpush3.msra.mxu1 %v3038_v43  ;;  %3752 = vmatprep.mubr.msk.f32.mxu1 %vm4159_vm0, %v4160_v1  ;;  %v3484_v43 = vld [vmem:[%s4804_s5] ss:$0 sm:$0xff] }
 0x482   : > { %3795 = vmatprep.subr.bf16.mxu1 %v4158_v0 }
 0x484   : > { %3753 = vmatmul.mubr.msk.f32.vlgmr.msra.gmra.mrb[32].mxu1 %vm662_vm3, %v2960_v42 }
 0x485   : > { %3774 = vmatprep.mubr.msk.f32.mxu1 %vm4159_vm0, %v4160_v1  ;;  %3797 = vmatpush3.bf16.msra.mxu1 %v3796_v6 }
 0x486   : > { %3798 = vmatprep.subr.bf16.mxu1 %v4158_v0 }
 0x489   : > { %3800 = vmatpush3.bf16.msra.mxu1 %v3799_v19 }
 0x4da   : > { %v746_v44 = vpop.f32.mrb[2].mxu1 }
 0x4db   : > { %823 = vst.msk [vmem:[#allocation2] sm:$0xff] %vm509_vm2, %v746_v44  ;;  %v3609_v45 = vpop.f32.mrb[3].mxu1 }
 0x4de   : > { %v819_v46 = vpop.f32.mrb[4].mxu1 }
 0x4df   : > { %824 = vst.msk [vmem:[#allocation3] sm:$0xff] %vm509_vm2, %v819_v46  ;;  %v3614_v47 = vpop.f32.mrb[5].mxu1 }
 0x4e6   : > { %v1065_v48 = vpop.f32.mrb[6].mxu1 }
 0x4e7   : > { %1143 = vrot.lane.b32.xlu0 %v1065_v48, %s4184_s15  ;;  %v3629_v49 = vpop.f32.mrb[7].mxu1 }
 0x4ea   : > { %v1138_v50 = vpop.f32.mrb[8].mxu1 }
 0x4eb   : > { %1149 = vrot.lane.b32.xlu1 %v1138_v50, %s4184_s15  ;;  %v3634_v51 = vpop.f32.mrb[9].mxu1  ;;  %s4072_s15 = scalar_lea.vmem %s4757_s11, 128 }
 0x4ec   : > { %p4073_p2 = scmp.ne.s32.totalorder %s4757_s11, %s4072_s15 }
 0x4ee   : > { %p4074_p6 = pnand %p4073_p2, %p4828_p13 }
 0x4f0   : > { %p4075_p10 = pneg %p4074_p6 }
 0x4f2   : > { %v1393_v52 = vpop.f32.mrb[10].mxu1 }
 0x4f3   : > { %1471 = vrot.lane.b32.xlu0 %v1393_v52, %s4185_s17  ;;  %v3649_v53 = vpop.f32.mrb[11].mxu1 }
 0x4f6   : > { %v1466_v1 = vpop.f32.mrb[12].mxu1 }
 0x4f7   : > { %1477 = vrot.lane.b32.xlu1 %v1466_v1, %s4185_s17  ;;  %v3654_v54 = vpop.f32.mrb[13].mxu1  ;;  %s4078_s17 = scalar_lea.vmem %s4077_s4, 256 }
 0x4f8   : > { %p4080_p5 = scmp.lt.s32.totalorder %s4078_s17, %s4072_s15 }
 0x4fa   : > { %p4081_p3 = por %p4080_p5, %p4079_p4 }
 0x4fc   : > { %p4082_p7 = pnand %p4081_p3, %p4075_p10 }
 0x4fe   : > { %v1721_v55 = vpop.f32.mrb[14].mxu1 }
 0x4ff   : > { %1799 = vrot.lane.b32.xlu0 %v1721_v55, %s4186_s29  ;;  %v3669_v56 = vpop.f32.mrb[15].mxu1 }
 0x502   : > { %v1794_v57 = vpop.f32.mrb[16].mxu1 }
 0x503   : > { %1805 = vrot.lane.b32.xlu1 %v1794_v57, %s4186_s29  ;;  %v3674_v58 = vpop.f32.mrb[17].mxu1 }
 0x52b   : > { %v2049_v59 = vpop.f32.mrb[18].mxu1 }
 0x52c   : > { %2127 = vrot.lane.b32.xlu0 %v2049_v59, %s4187_s7  ;;  %v3689_v60 = vpop.f32.mrb[19].mxu1 }
 0x52f   : > { %v2122_v61 = vpop.f32.mrb[20].mxu1 }
 0x530   : > { %2133 = vrot.lane.b32.xlu1 %v2122_v61, %s4187_s7  ;;  %v3694_v62 = vpop.f32.mrb[21].mxu1 }
 0x543   : > { %v2377_v63 = vpop.f32.mrb[22].mxu1 }
 0x544   : > { %2455 = vrot.lane.b32.xlu0 %v2377_v63, %s4188_s8  ;;  %v3709_v2 = vpop.f32.mrb[23].mxu1 }
 0x547   : > { %v2450_v5 = vpop.f32.mrb[24].mxu1 }
 0x548   : > { %2461 = vrot.lane.b32.xlu1 %v2450_v5, %s4188_s8  ;;  %v3714_v7 = vpop.f32.mrb[25].mxu1 }
 0x54b   : > { %v2705_v11 = vpop.f32.mrb[26].mxu1 }
 0x54c   : > { %2783 = vrot.lane.b32.xlu0 %v2705_v11, %s4189_s27  ;;  %v3729_v14 = vpop.f32.mrb[27].mxu1 }
 0x54f   : > { %v2778_v16 = vpop.f32.mrb[28].mxu1 }
 0x550   : > { %2789 = vrot.lane.b32.xlu1 %v2778_v16, %s4189_s27  ;;  %v3734_v18 = vpop.f32.mrb[29].mxu1 }
 0x553   : > { %v3033_v20 = vpop.f32.mrb[30].mxu1 }
 0x554   : > { %3111 = vrot.lane.b32.xlu0 %v3033_v20, %s4190_s18  ;;  %v3749_v21 = vpop.f32.mrb[31].mxu1 }
 0x557   : > { %v3106_v22 = vpop.f32.mrb[32].mxu1 }
 0x558   : > { %3117 = vrot.lane.b32.xlu1 %v3106_v22, %s4190_s18  ;;  %v3754_v24 = vpop.f32.mrb[33].mxu1 }
 0x559   : > { %v1144_v25 = vpop.permute.xlu0 %1143 }
 0x55a   : > { %1147 = vst.msk [vmem:[#allocation2] sm:$0xff] %vm1146_vm4, %v1144_v25 }
 0x55d   : > { %v1150_v26 = vpop.permute.xlu1 %1149 }
 0x55e   : > { %1152 = vst.msk [vmem:[#allocation3] sm:$0xff] %vm1146_vm4, %v1150_v26 }
 0x565   : > { %v1472_v0 = vpop.permute.xlu0 %1471 }
 0x566   : > { %1475 = vst.msk [vmem:[#allocation2] sm:$0xff] %vm1474_vm5, %v1472_v0 }
 0x569   : > { %v1478_v27 = vpop.permute.xlu1 %1477 }
 0x56a   : > { %1480 = vst.msk [vmem:[#allocation3] sm:$0xff] %vm1474_vm5, %v1478_v27 }
 0x571   : > { %v1800_v28 = vpop.permute.xlu0 %1799 }
 0x572   : > { %1803 = vst.msk [vmem:[#allocation2] sm:$0xff] %vm1802_vm6, %v1800_v28 }
 0x575   : > { %v1806_v29 = vpop.permute.xlu1 %1805 }
 0x576   : > { %1808 = vst.msk [vmem:[#allocation3] sm:$0xff] %vm1802_vm6, %v1806_v29 }
 0x59e   : > { %v2128_v30 = vpop.permute.xlu0 %2127 }
 0x59f   : > { %2131 = vst.msk [vmem:[#allocation2] sm:$0xff] %vm2130_vm7, %v2128_v30 }
 0x5a2   : > { %v2134_v31 = vpop.permute.xlu1 %2133 }
 0x5a3   : > { %2136 = vst.msk [vmem:[#allocation3] sm:$0xff] %vm2130_vm7, %v2134_v31 }
 0x5b6   : > { %v2456_v32 = vpop.permute.xlu0 %2455 }
 0x5b7   : > { %2459 = vst.msk [vmem:[#allocation2] sm:$0xff] %vm2458_vm8, %v2456_v32 }
 0x5ba   : > { %v2462_v33 = vpop.permute.xlu1 %2461 }
 0x5bb   : > { %2464 = vst.msk [vmem:[#allocation3] sm:$0xff] %vm2458_vm8, %v2462_v33 }
 0x5be   : > { %v2784_v34 = vpop.permute.xlu0 %2783 }
 0x5bf   : > { %2787 = vst.msk [vmem:[#allocation2] sm:$0xff] %vm2786_vm9, %v2784_v34 }
 0x5c2   : > { %v2790_v35 = vpop.permute.xlu1 %2789 }
 0x5c3   : > { %2792 = vst.msk [vmem:[#allocation3] sm:$0xff] %vm2786_vm9, %v2790_v35 }
 0x5c6   : > { %v3112_v36 = vpop.permute.xlu0 %3111 }
 0x5c7   : > { %3115 = vst.msk [vmem:[#allocation2] sm:$0xff] %vm3114_vm10, %v3112_v36 }
 0x5ca   : > { %v3118_v37 = vpop.permute.xlu1 %3117 }
 0x5cb   : > { %3120 = vst.msk [vmem:[#allocation3] sm:$0xff] %vm3114_vm10, %v3118_v37 }
 0x5ce   : > { %v3121_v38 = vld [vmem:[#allocation2] sm:$0xff] }
 0x5cf   : > { %3775 = vmatmul.mubr.msk.f32.vlgmr.msra.gmra.mrb[34].mxu1 %vm346_vm1, %v3121_v38 }
 0x5d2   : > { %v3126_v39 = vld [vmem:[#allocation3] sm:$0xff] }
 0x5d3   : > { %3764 = vmatmul.mubr.msk.f32.vlgmr.msra.gmra.mrb[18].mxu0 %vm346_vm1, %v3126_v39 }
 0x6a2   : > { %v3274_v40 = vpop.f32.mrb[34].mxu1 }
 0x6a3   : > { %v3776_v41 = vpop.f32.mrb[35].mxu1 }
 0x6a6   : > { %v3201_v42 = vpop.f32.mrb[18].mxu0 }
 0x6a7   : > { %v3275_v44 = vadd.f32 %v3274_v40, %v3201_v42  ;;  %v3765_v45 = vpop.f32.mrb[19].mxu0 }
 0x6a9   : > { %v3285_v46 = vadd.f32 %v3484_v43, %v3275_v44 }
 0x6ab   : > { %3287 = vst.msk [vmem:[%s332_s19] sm:$0xff] %vm3286_vm11, %v3285_v46 }
 0x6ac   : > { %4085 = shalt.err (!%p4082_p7)
}
 0x6ad   : > { %s4086_s20 = scalar_lea.hbm %s4755_s16, 128  ;;  %s4090_s8 = scalar_lea.hbm %s4805_s6, 256 }
 0x6ae   : > { %p4087_p1 = scmp.ne.s32.totalorder %s4755_s16, %s4086_s20  ;;  %p4091_p0 = scmp.lt.u32.totalorder %s4755_s16, %s4805_s6 }
 0x6af   : > { %p4092_p9 = scmp.lt.u32.totalorder %s4090_s8, %s4086_s20  ;;  %p4094_p2 = scmp.lt.u32.totalorder %s4086_s20, %s4755_s16 }
 0x6b0   : > { %p4088_p8 = pnand %p4087_p1, %p4828_p13 }
 0x6b1   : > { %p4093_p12 = por %p4092_p9, %p4091_p0 }
 0x6b2   : > { %p4089_p11 = pneg %p4088_p8 }
 0x6b3   : > { %p4095_p6 = por %p4094_p2, %p4093_p12 }
 0x6b5   : > { %p4096_p10 = pnand %p4095_p6, %p4089_p11 }
 0x6b7   : > { %4099 = shalt.err (!%p4096_p10)
}
 0x6b8   : > { %3829 = dma.vmem_to_hbm [thread:$0]  (%p4828_p13), %s4757_s11, 128, %s4755_s16, %s3289_s30  }
 0x6b9 PF: > { %s3314_s13 = sand.u32 1, %s4138_s21   ;;  %p4829_p4 = scmp.ne.s32.totalorder %s4813_s28, 0 }
 0x6ba   : > { %p4830_p5 = scmp.ge.s32.totalorder %s4150_s24, 2  ;;  %s3315_s12 = scalar_lea.sflag [#allocation6], %s3314_s13 }
 0x6bc   : > { %p3846_p3 = pnand %p4830_p5, %p4829_p4 }
 0x6be   : > { %4133 = dma.done.wait (!%p3846_p3), %s3315_s12, 128  }
 0x6bf   : > { %4135 = vsyncadd (!%p3846_p3), %s3315_s12, 4294967168  ;;  %s4831_s2 = sld [smem:[#allocation18_spill]]  ;;  %p23_p7 = scmp.ge.s32.totalorder %s4337_s26, 4  }
 0x6c0   : > { %s4832_s21 = smov %s4142_s22  ;;  %s4833_s22 = smov %s4146_s23 }
 0x6c1   : > { %s4835_s24 = smov %s4337_s26  ;;  %25 = sbr.rel (!%p23_p7) target bundleno = 11 (0xb), region = 113 }
 0x6c5   : > { %s4834_s23 = smov %s4831_s2 }
 0x6c8   :  { %3320 = vsyncpa [#allocation5], 1 }
 0x6c9   :  { %3322 = vsyncpa [#allocation5 + $0x1], 1 }
 0x6ca   :  { %3323 = vsyncpa [#allocation8], 1 }
 0x6cb   :  { %3325 = vsyncpa [#allocation8 + $0x1], 1 }
 0x6cc   :  { %3326 = vsyncpa [#allocation11], 1 }
 0x6cd   :  { %3327 = vsyncpa [#allocation6], 1 }
 0x6ce   :  { %3329 = vsyncpa [#allocation6 + $0x1], 1 }

</bundles_post_ra>
